<compile_context>
chip_gen: v6e
topology: v6e:2x2x1
jax: 0.10.0
libtpu: 0.0.40
codegen_flags: <defaults>
</compile_context>

<pallas_src>
import functools

import jax
import jax.numpy as jnp
from jax import lax
from jax.experimental import pallas as pl
from jax.experimental.pallas import tpu as pltpu

X_SIZE = 64                  # stand-in for config.data.x_size (not given)
HIDDEN = (512, 128, 32, 8)
DIMS = (X_SIZE,) + HIDDEN    # layer i maps DIMS[i] -> DIMS[i+1]
PACK_W = 512                 # lane width of the packed small-parameter array
EPS = 1e-5
LEAK = 0.2
_FUSED_MAX_BATCH = 4096      # above this, whole-batch activations risk VMEM


def _vmem_limit_bytes():
    """Generation-aware VMEM request: <= 3/4 of physical, capped at 64 MiB."""
    cap = 128 * 1024 * 1024
    try:
        cap = pltpu.get_tpu_info().vmem_capacity_bytes
    except Exception:
        pass
    return int(min(64 * 1024 * 1024, (cap * 3) // 4))


# ---------------------------------------------------------------------------
# Kernel helpers
# ---------------------------------------------------------------------------
def _affine_from_stats(s, sq, gamma, beta, inv_b):
    """BN affine (scale, shift) from sum / sum-of-squares over the batch."""
    mu = s * inv_b
    var = jnp.maximum(sq * inv_b - mu * mu, 0.0)     # clamp tiny negative var
    scale = gamma * lax.rsqrt(var + EPS)             # fold gamma into rsqrt
    shift = beta - mu * scale
    return scale, shift


def _bn_lrelu(y, gamma, beta, inv_b):
    """Training-mode BatchNorm1d + LeakyReLU(0.2) on a whole-batch (B,F) tile."""
    s = jnp.sum(y, axis=0, keepdims=True)
    sq = jnp.sum(y * y, axis=0, keepdims=True)
    scale, shift = _affine_from_stats(s, sq, gamma, beta, inv_b)
    y = y * scale + shift
    return jnp.maximum(y, LEAK * y)                  # LeakyReLU(0.2)


# ---------------------------------------------------------------------------
# Fused whole-batch kernel (small / medium B)
# ---------------------------------------------------------------------------
def fused_discriminator_kernel(x_ref, w1_ref, w2_ref, wp_ref, pk_ref, out_ref,
                               *, inv_b):
    # Layer 1.  x and w1 are pre-cast on the host to the matmul dtype;
    # b1..b4 omitted (cancelled by the batch-mean subtraction of training BN).
    y = jnp.dot(x_ref[...], w1_ref[...], preferred_element_type=jnp.float32)
    h = _bn_lrelu(y, pk_ref[0:1, 0:512], pk_ref[1:2, 0:512], inv_b)

    # Layer 2 (hot matmul): cast the activation once to the weight dtype.
    y = jnp.dot(h.astype(w2_ref.dtype), w2_ref[...],
                preferred_element_type=jnp.float32)
    h = _bn_lrelu(y, pk_ref[2:3, 0:128], pk_ref[3:4, 0:128], inv_b)

    # Layers 3/4: tiny f32 matmuls, weights sliced from the packed slab.
    y = jnp.dot(h, wp_ref[0:128, 0:32], preferred_element_type=jnp.float32)
    h = _bn_lrelu(y, pk_ref[4:5, 0:32], pk_ref[5:6, 0:32], inv_b)
    y = jnp.dot(h, wp_ref[128:160, 0:8], preferred_element_type=jnp.float32)
    h = _bn_lrelu(y, pk_ref[6:7, 0:8], pk_ref[7:8, 0:8], inv_b)

    # Head: Linear(8,1) + Sigmoid on the VPU/XLU/EUP (MXU with N=1 would
    # waste 127/128 of the result tile).
    w5 = pk_ref[8:9, 0:8]          # (1, 8)
    b5 = pk_ref[9:10, 0:1]         # (1, 1)
    logits = jnp.sum(h * w5, axis=-1, keepdims=True) + b5
    out_ref[...] = pl.reciprocal(1.0 + jnp.exp(-logits), approx=True)


# ---------------------------------------------------------------------------
# Batch-tiled two-pass-BN kernels (large B / v7x dual core)
# ---------------------------------------------------------------------------
def linear_stats_kernel(x_ref, w_ref, y_ref, ps_ref):
    """y = x @ W for one batch tile, plus per-tile partial BN stats."""
    y = jnp.dot(x_ref[...], w_ref[...], preferred_element_type=jnp.float32)
    y_ref[...] = y.astype(y_ref.dtype)
    ps_ref[0, 0:1, :] = jnp.sum(y, axis=0, keepdims=True)
    ps_ref[0, 1:2, :] = jnp.sum(y * y, axis=0, keepdims=True)


def bn_linear_stats_kernel(stats_ref, gb_ref, y_in_ref, w_ref,
                           y_out_ref, ps_ref, *, inv_b):
    """BN(combined stats) + LeakyReLU + Linear for one batch tile + new stats."""
    scale, shift = _affine_from_stats(stats_ref[0:1, :], stats_ref[1:2, :],
                                      gb_ref[0:1, :], gb_ref[1:2, :], inv_b)
    h = y_in_ref[...] * scale + shift            # promotes to f32
    h = jnp.maximum(h, LEAK * h)
    y = jnp.dot(h.astype(w_ref.dtype), w_ref[...],
                preferred_element_type=jnp.float32)
    y_out_ref[...] = y.astype(y_out_ref.dtype)
    ps_ref[0, 0:1, :] = jnp.sum(y, axis=0, keepdims=True)
    ps_ref[0, 1:2, :] = jnp.sum(y * y, axis=0, keepdims=True)


def bn_head_kernel(stats_ref, gb_ref, w5b5_ref, y_in_ref, out_ref, *, inv_b):
    """BN4 + LeakyReLU + Linear(8,1) + Sigmoid for one batch tile."""
    scale, shift = _affine_from_stats(stats_ref[0:1, :], stats_ref[1:2, :],
                                      gb_ref[0:1, :], gb_ref[1:2, :], inv_b)
    h = y_in_ref[...] * scale + shift
    h = jnp.maximum(h, LEAK * h)
    w5 = w5b5_ref[0:1, :]          # (1, 8)
    b5 = w5b5_ref[1:2, 0:1]        # (1, 1)
    logits = jnp.sum(h * w5, axis=-1, keepdims=True) + b5
    out_ref[...] = pl.reciprocal(1.0 + jnp.exp(-logits), approx=True)


# ---------------------------------------------------------------------------
# Parameter construction / packing (host side, plain JAX)
# ---------------------------------------------------------------------------
def init_params(key):
    """Synthetic parameters matching the module's layer shapes."""
    dims = DIMS + (1,)
    ws = []
    for i in range(len(dims) - 1):
        fan_in, fan_out = dims[i], dims[i + 1]
        key, kw = jax.random.split(key)
        ws.append(jax.random.normal(kw, (fan_in, fan_out), jnp.float32)
                  * (2.0 / fan_in) ** 0.5)
    key, kb = jax.random.split(key)
    b5 = jax.random.normal(kb, (), jnp.float32) * 0.01
    # A fresh nn.BatchNorm1d has gamma=1, beta=0; randomize slightly so the
    # correctness check actually exercises the affine parameters.
    gammas, betas = [], []
    for h in HIDDEN:
        key, kg, kbe = jax.random.split(key, 3)
        gammas.append(1.0 + 0.1 * jax.random.normal(kg, (h,), jnp.float32))
        betas.append(0.1 * jax.random.normal(kbe, (h,), jnp.float32))
    return ws, gammas, betas, b5


def pack_small_params(gammas, betas, w5, b5):
    """gamma/beta (4 layers), w5, b5 -> one (16, 512) f32 array."""
    pk = jnp.zeros((16, PACK_W), jnp.float32)
    for i, (g, b) in enumerate(zip(gammas, betas)):
        pk = pk.at[2 * i, : g.shape[0]].set(g)
        pk = pk.at[2 * i + 1, : b.shape[0]].set(b)
    pk = pk.at[8, :8].set(w5.reshape(-1))
    pk = pk.at[9, 0].set(b5)
    return pk


def pack_w34(w3, w4):
    """w3 (128,32) and w4 (32,8) -> one (160, 32) f32 slab."""
    wp = jnp.zeros((160, 32), jnp.float32)
    wp = wp.at[0:128, 0:32].set(w3)
    wp = wp.at[128:160, 0:8].set(w4)
    return wp


def prepare_params(ws, gammas, betas, b5, *, matmul_dtype=jnp.bfloat16):
    """One-time host-side packing; w1/w2 are stored pre-cast (bf16 default)."""
    w5b5 = jnp.zeros((2, 8), jnp.float32)
    w5b5 = w5b5.at[0, :].set(ws[4].reshape(-1)).at[1, 0].set(b5)
    return dict(
        matmul_dtype=jnp.dtype(matmul_dtype),
        w1=ws[0].astype(matmul_dtype),
        w2=ws[1].astype(matmul_dtype),
        w3=ws[2],                        # tiny; kept f32
        w4=ws[3],                        # tiny; kept f32
        wp34=pack_w34(ws[2], ws[3]),     # fused-path slab
        pk=pack_small_params(gammas, betas, ws[4], b5),
        gb=tuple(jnp.stack([g, b]) for g, b in zip(gammas, betas)),
        w5b5=w5b5,
    )


# ---------------------------------------------------------------------------
# Wrappers
# ---------------------------------------------------------------------------
def discriminator_forward_fused(x, params):
    """Single fused whole-batch kernel (B must fit comfortably in VMEM)."""
    B = x.shape[0]
    mm = params["matmul_dtype"]
    kernel = functools.partial(fused_discriminator_kernel, inv_b=1.0 / B)
    return pl.pallas_call(
        kernel,
        out_shape=jax.ShapeDtypeStruct((B, 1), jnp.float32),
        in_specs=[pl.BlockSpec(memory_space=pltpu.MemorySpace.VMEM)] * 5,
        out_specs=pl.BlockSpec(memory_space=pltpu.MemorySpace.VMEM),
        compiler_params=pltpu.CompilerParams(
            vmem_limit_bytes=_vmem_limit_bytes()),
    )(x.astype(mm), params["w1"], params["w2"], params["wp34"], params["pk"])


def _pick_tile_b(B):
    if B <= 1024:
        return B
    for t in range(1024, 7, -8):
        if B % t == 0:
            return t
    # TODO(synk): pad the batch and mask the partial stats when B has no
    # multiple-of-8 tile divisor; fall back to a single whole-batch tile.
    return B


def discriminator_forward_tiled(x, params, *, tile_b=None):
    """Batch-tiled two-pass BN: per-tile Linear + partial (sum, sumsq) stats,
    host combine, then per-tile normalize+LeakyReLU fused into the next
    Linear.  Batch axis is 'parallel' (both TensorCores on v7x)."""
    B = x.shape[0]
    mm = params["matmul_dtype"]
    tile_b = _pick_tile_b(B) if tile_b is None else tile_b
    assert B % tile_b == 0 and (tile_b % 8 == 0 or tile_b == B)
    nt = B // tile_b
    inv_b = 1.0 / B
    cp = pltpu.CompilerParams(dimension_semantics=("parallel",),
                              vmem_limit_bytes=_vmem_limit_bytes())

    # Layer 1: Linear + per-tile partial BN stats.
    y, ps = pl.pallas_call(
        linear_stats_kernel,
        grid=(nt,),
        in_specs=(pl.BlockSpec((tile_b, DIMS[0]), lambda i: (i, 0)),
                  pl.BlockSpec((DIMS[0], DIMS[1]), lambda i: (0, 0))),
        out_specs=(pl.BlockSpec((tile_b, DIMS[1]), lambda i: (i, 0)),
                   pl.BlockSpec((1, 2, DIMS[1]), lambda i: (i, 0, 0))),
        out_shape=(jax.ShapeDtypeStruct((B, DIMS[1]), mm),
                   jax.ShapeDtypeStruct((nt, 2, DIMS[1]), jnp.float32)),
        compiler_params=cp,
    )(x.astype(mm), params["w1"])
    stats = jnp.sum(ps, axis=0)                 # combine per-tile stats (tiny)

    # Layers 2..4: BN(prev stats) + LeakyReLU + Linear + new partial stats.
    layer_w = (params["w2"], params["w3"], params["w4"])
    for li in range(1, 4):
        f_in, f_out = DIMS[li], DIMS[li + 1]
        y, ps = pl.pallas_call(
            functools.partial(bn_linear_stats_kernel, inv_b=inv_b),
            grid=(nt,),
            in_specs=(pl.BlockSpec((2, f_in), lambda i: (0, 0)),
                      pl.BlockSpec((2, f_in), lambda i: (0, 0)),
                      pl.BlockSpec((tile_b, f_in), lambda i: (i, 0)),
                      pl.BlockSpec((f_in, f_out), lambda i: (0, 0))),
            out_specs=(pl.BlockSpec((tile_b, f_out), lambda i: (i, 0)),
                       pl.BlockSpec((1, 2, f_out), lambda i: (i, 0, 0))),
            out_shape=(jax.ShapeDtypeStruct((B, f_out), mm),
                       jax.ShapeDtypeStruct((nt, 2, f_out), jnp.float32)),
            compiler_params=cp,
        )(stats, params["gb"][li - 1], y, layer_w[li - 1])
        stats = jnp.sum(ps, axis=0)

    # Head: BN4 + LeakyReLU + Linear(8,1) + Sigmoid.
    out = pl.pallas_call(
        functools.partial(bn_head_kernel, inv_b=inv_b),
        grid=(nt,),
        in_specs=(pl.BlockSpec((2, 8), lambda i: (0, 0)),
                  pl.BlockSpec((2, 8), lambda i: (0, 0)),
                  pl.BlockSpec((2, 8), lambda i: (0, 0)),
                  pl.BlockSpec((tile_b, 8), lambda i: (i, 0))),
        out_specs=pl.BlockSpec((tile_b, 1), lambda i: (i, 0)),
        out_shape=jax.ShapeDtypeStruct((B, 1), jnp.float32),
        compiler_params=cp,
    )(stats, params["gb"][3], params["w5b5"], y)
    return out


def discriminator_forward(x, params):
    """Dispatch: fused whole-batch kernel for small B, batch-tiled otherwise."""
    if x.shape[0] <= _FUSED_MAX_BATCH:
        return discriminator_forward_fused(x, params)
    return discriminator_forward_tiled(x, params)


# ---------------------------------------------------------------------------
# Pure-JAX reference (same semantics, for a sanity check)
# ---------------------------------------------------------------------------
def reference_forward(x, ws, gammas, betas, b5):
    h = x
    for w, g, be in zip(ws[:4], gammas, betas):
        y = jnp.dot(h, w, precision=lax.Precision.HIGHEST)
        mu = jnp.mean(y, axis=0, keepdims=True)
        var = jnp.mean((y - mu) ** 2, axis=0, keepdims=True)
        y = (y - mu) / jnp.sqrt(var + EPS) * g + be
        h = jnp.where(y >= 0.0, y, LEAK * y)
    logits = jnp.dot(h, ws[4], precision=lax.Precision.HIGHEST) + b5
    return jax.nn.sigmoid(logits)


if __name__ == "__main__":
    key = jax.random.PRNGKey(0)
    key, kx, kp = jax.random.split(key, 3)

    B = 64  # small demo batch
    x = jax.random.normal(kx, (B, X_SIZE), jnp.float32)
    ws, gammas, betas, b5 = init_params(kp)
    ref = jax.block_until_ready(reference_forward(x, ws, gammas, betas, b5))

    def _check(out, tol, tag):
        out = jax.block_until_ready(out)
        assert out.shape == (B, 1), (tag, out.shape)
        assert bool(jnp.all(jnp.isfinite(out))), tag
        assert bool(jnp.all((out >= -1e-3) & (out <= 1.0 + 1e-3))), tag
        diff = float(jnp.max(jnp.abs(out - ref)))
        assert diff < tol, f"{tag}: max diff {diff} >= {tol}"

    # 1) Fused whole-batch kernel, f32 MXU operands.
    p_f32 = prepare_params(ws, gammas, betas, b5, matmul_dtype=jnp.float32)
    _check(discriminator_forward(x, p_f32), 3e-2, "fused f32")

    # 2) Fused whole-batch kernel, bf16 MXU operands (default for v6e/v7x).
    p_bf16 = prepare_params(ws, gammas, betas, b5, matmul_dtype=jnp.bfloat16)
    _check(discriminator_forward_fused(x, p_bf16), 1e-1, "fused bf16")

    # 3) Batch-tiled two-pass-BN path, forced to 2 tiles to exercise the grid.
    _check(discriminator_forward_tiled(x, p_bf16, tile_b=32), 1e-1, "tiled bf16")

    print("KERNEL_OK")
</pallas_src>

<mosaic_0001>
module attributes {stable_mosaic.version = 11 : i64} {
  func.func @fused_discriminator_kernel(%arg0: memref<64x64xf32, #tpu.memory_space<vmem>>, %arg1: memref<64x512xf32, #tpu.memory_space<vmem>>, %arg2: memref<512x128xf32, #tpu.memory_space<vmem>>, %arg3: memref<160x32xf32, #tpu.memory_space<vmem>>, %arg4: memref<16x512xf32, #tpu.memory_space<vmem>>, %arg5: memref<64x1xf32, #tpu.memory_space<vmem>>) attributes {dimension_semantics = [], scalar_prefetch = 0 : i64, scratch_operands = 0 : i64, tpu.core_type = #tpu.core_type<tc>} {
    %c0 = arith.constant 0 : index
    %c0_0 = arith.constant 0 : index
    %0 = vector.load %arg0[%c0, %c0_0] : memref<64x64xf32, #tpu.memory_space<vmem>>, vector<64x64xf32>
    %c0_1 = arith.constant 0 : index
    %c0_2 = arith.constant 0 : index
    %1 = vector.load %arg1[%c0_1, %c0_2] : memref<64x512xf32, #tpu.memory_space<vmem>>, vector<64x512xf32>
    %cst = arith.constant dense<0.000000e+00> : vector<64x512xf32>
    %2 = tpu.matmul %0, %1, %cst {dimension_numbers = #tpu.dot_dimension_numbers<[1], [0], [0], [1], [0, 0, 1, 1], [], []>} : vector<64x64xf32>, vector<64x512xf32>, vector<64x512xf32> -> vector<64x512xf32>
    %c0_3 = arith.constant 0 : index
    %c0_4 = arith.constant 0 : index
    %3 = vector.load %arg4[%c0_3, %c0_4] : memref<16x512xf32, #tpu.memory_space<vmem>>, vector<1x512xf32>
    %c1 = arith.constant 1 : index
    %c0_5 = arith.constant 0 : index
    %4 = vector.load %arg4[%c1, %c0_5] : memref<16x512xf32, #tpu.memory_space<vmem>>, vector<1x512xf32>
    %cst_6 = arith.constant dense<0.000000e+00> : vector<512xf32>
    %5 = vector.multi_reduction <add>, %2, %cst_6 [0] : vector<64x512xf32> to vector<512xf32>
    %6 = vector.shape_cast %5 : vector<512xf32> to vector<1x512xf32>
    %7 = arith.mulf %2, %2 : vector<64x512xf32>
    %cst_7 = arith.constant dense<0.000000e+00> : vector<512xf32>
    %8 = vector.multi_reduction <add>, %7, %cst_7 [0] : vector<64x512xf32> to vector<512xf32>
    %9 = vector.shape_cast %8 : vector<512xf32> to vector<1x512xf32>
    %cst_8 = arith.constant 1.562500e-02 : f32
    %10 = vector.broadcast %cst_8 : f32 to vector<1x512xf32>
    %11 = arith.mulf %6, %10 : vector<1x512xf32>
    %cst_9 = arith.constant 1.562500e-02 : f32
    %12 = vector.broadcast %cst_9 : f32 to vector<1x512xf32>
    %13 = arith.mulf %9, %12 : vector<1x512xf32>
    %14 = arith.mulf %11, %11 : vector<1x512xf32>
    %15 = arith.subf %13, %14 : vector<1x512xf32>
    %cst_10 = arith.constant 0.000000e+00 : f32
    %16 = vector.broadcast %cst_10 : f32 to vector<1x512xf32>
    %17 = arith.maximumf %15, %16 : vector<1x512xf32>
    %cst_11 = arith.constant 9.99999974E-6 : f32
    %18 = vector.broadcast %cst_11 : f32 to vector<1x512xf32>
    %19 = arith.addf %17, %18 : vector<1x512xf32>
    %20 = math.rsqrt %19 : vector<1x512xf32>
    %21 = arith.mulf %3, %20 : vector<1x512xf32>
    %22 = arith.mulf %11, %21 : vector<1x512xf32>
    %23 = arith.subf %4, %22 : vector<1x512xf32>
    %24 = vector.broadcast %21 : vector<1x512xf32> to vector<64x512xf32>
    %25 = arith.mulf %2, %24 : vector<64x512xf32>
    %26 = vector.broadcast %23 : vector<1x512xf32> to vector<64x512xf32>
    %27 = arith.addf %25, %26 : vector<64x512xf32>
    %cst_12 = arith.constant 2.000000e-01 : f32
    %28 = vector.broadcast %cst_12 : f32 to vector<64x512xf32>
    %29 = arith.mulf %28, %27 : vector<64x512xf32>
    %30 = arith.maximumf %27, %29 : vector<64x512xf32>
    %c0_13 = arith.constant 0 : index
    %c0_14 = arith.constant 0 : index
    %31 = vector.load %arg2[%c0_13, %c0_14] : memref<512x128xf32, #tpu.memory_space<vmem>>, vector<512x128xf32>
    %cst_15 = arith.constant dense<0.000000e+00> : vector<64x128xf32>
    %32 = tpu.matmul %30, %31, %cst_15 {dimension_numbers = #tpu.dot_dimension_numbers<[1], [0], [0], [1], [0, 0, 1, 1], [], []>} : vector<64x512xf32>, vector<512x128xf32>, vector<64x128xf32> -> vector<64x128xf32>
    %c2 = arith.constant 2 : index
    %c0_16 = arith.constant 0 : index
    %33 = vector.load %arg4[%c2, %c0_16] : memref<16x512xf32, #tpu.memory_space<vmem>>, vector<1x128xf32>
    %c3 = arith.constant 3 : index
    %c0_17 = arith.constant 0 : index
    %34 = vector.load %arg4[%c3, %c0_17] : memref<16x512xf32, #tpu.memory_space<vmem>>, vector<1x128xf32>
    %cst_18 = arith.constant dense<0.000000e+00> : vector<128xf32>
    %35 = vector.multi_reduction <add>, %32, %cst_18 [0] : vector<64x128xf32> to vector<128xf32>
    %36 = vector.shape_cast %35 : vector<128xf32> to vector<1x128xf32>
    %37 = arith.mulf %32, %32 : vector<64x128xf32>
    %cst_19 = arith.constant dense<0.000000e+00> : vector<128xf32>
    %38 = vector.multi_reduction <add>, %37, %cst_19 [0] : vector<64x128xf32> to vector<128xf32>
    %39 = vector.shape_cast %38 : vector<128xf32> to vector<1x128xf32>
    %cst_20 = arith.constant 1.562500e-02 : f32
    %40 = vector.broadcast %cst_20 : f32 to vector<1x128xf32>
    %41 = arith.mulf %36, %40 : vector<1x128xf32>
    %cst_21 = arith.constant 1.562500e-02 : f32
    %42 = vector.broadcast %cst_21 : f32 to vector<1x128xf32>
    %43 = arith.mulf %39, %42 : vector<1x128xf32>
    %44 = arith.mulf %41, %41 : vector<1x128xf32>
    %45 = arith.subf %43, %44 : vector<1x128xf32>
    %cst_22 = arith.constant 0.000000e+00 : f32
    %46 = vector.broadcast %cst_22 : f32 to vector<1x128xf32>
    %47 = arith.maximumf %45, %46 : vector<1x128xf32>
    %cst_23 = arith.constant 9.99999974E-6 : f32
    %48 = vector.broadcast %cst_23 : f32 to vector<1x128xf32>
    %49 = arith.addf %47, %48 : vector<1x128xf32>
    %50 = math.rsqrt %49 : vector<1x128xf32>
    %51 = arith.mulf %33, %50 : vector<1x128xf32>
    %52 = arith.mulf %41, %51 : vector<1x128xf32>
    %53 = arith.subf %34, %52 : vector<1x128xf32>
    %54 = vector.broadcast %51 : vector<1x128xf32> to vector<64x128xf32>
    %55 = arith.mulf %32, %54 : vector<64x128xf32>
    %56 = vector.broadcast %53 : vector<1x128xf32> to vector<64x128xf32>
    %57 = arith.addf %55, %56 : vector<64x128xf32>
    %cst_24 = arith.constant 2.000000e-01 : f32
    %58 = vector.broadcast %cst_24 : f32 to vector<64x128xf32>
    %59 = arith.mulf %58, %57 : vector<64x128xf32>
    %60 = arith.maximumf %57, %59 : vector<64x128xf32>
    %c0_25 = arith.constant 0 : index
    %c0_26 = arith.constant 0 : index
    %61 = vector.load %arg3[%c0_25, %c0_26] : memref<160x32xf32, #tpu.memory_space<vmem>>, vector<128x32xf32>
    %cst_27 = arith.constant dense<0.000000e+00> : vector<64x32xf32>
    %62 = tpu.matmul %60, %61, %cst_27 {dimension_numbers = #tpu.dot_dimension_numbers<[1], [0], [0], [1], [0, 0, 1, 1], [], []>} : vector<64x128xf32>, vector<128x32xf32>, vector<64x32xf32> -> vector<64x32xf32>
    %c4 = arith.constant 4 : index
    %c0_28 = arith.constant 0 : index
    %63 = vector.load %arg4[%c4, %c0_28] : memref<16x512xf32, #tpu.memory_space<vmem>>, vector<1x32xf32>
    %c5 = arith.constant 5 : index
    %c0_29 = arith.constant 0 : index
    %64 = vector.load %arg4[%c5, %c0_29] : memref<16x512xf32, #tpu.memory_space<vmem>>, vector<1x32xf32>
    %cst_30 = arith.constant dense<0.000000e+00> : vector<32xf32>
    %65 = vector.multi_reduction <add>, %62, %cst_30 [0] : vector<64x32xf32> to vector<32xf32>
    %66 = vector.shape_cast %65 : vector<32xf32> to vector<1x32xf32>
    %67 = arith.mulf %62, %62 : vector<64x32xf32>
    %cst_31 = arith.constant dense<0.000000e+00> : vector<32xf32>
    %68 = vector.multi_reduction <add>, %67, %cst_31 [0] : vector<64x32xf32> to vector<32xf32>
    %69 = vector.shape_cast %68 : vector<32xf32> to vector<1x32xf32>
    %cst_32 = arith.constant 1.562500e-02 : f32
    %70 = vector.broadcast %cst_32 : f32 to vector<1x32xf32>
    %71 = arith.mulf %66, %70 : vector<1x32xf32>
    %cst_33 = arith.constant 1.562500e-02 : f32
    %72 = vector.broadcast %cst_33 : f32 to vector<1x32xf32>
    %73 = arith.mulf %69, %72 : vector<1x32xf32>
    %74 = arith.mulf %71, %71 : vector<1x32xf32>
    %75 = arith.subf %73, %74 : vector<1x32xf32>
    %cst_34 = arith.constant 0.000000e+00 : f32
    %76 = vector.broadcast %cst_34 : f32 to vector<1x32xf32>
    %77 = arith.maximumf %75, %76 : vector<1x32xf32>
    %cst_35 = arith.constant 9.99999974E-6 : f32
    %78 = vector.broadcast %cst_35 : f32 to vector<1x32xf32>
    %79 = arith.addf %77, %78 : vector<1x32xf32>
    %80 = math.rsqrt %79 : vector<1x32xf32>
    %81 = arith.mulf %63, %80 : vector<1x32xf32>
    %82 = arith.mulf %71, %81 : vector<1x32xf32>
    %83 = arith.subf %64, %82 : vector<1x32xf32>
    %84 = vector.broadcast %81 : vector<1x32xf32> to vector<64x32xf32>
    %85 = arith.mulf %62, %84 : vector<64x32xf32>
    %86 = vector.broadcast %83 : vector<1x32xf32> to vector<64x32xf32>
    %87 = arith.addf %85, %86 : vector<64x32xf32>
    %cst_36 = arith.constant 2.000000e-01 : f32
    %88 = vector.broadcast %cst_36 : f32 to vector<64x32xf32>
    %89 = arith.mulf %88, %87 : vector<64x32xf32>
    %90 = arith.maximumf %87, %89 : vector<64x32xf32>
    %c128 = arith.constant 128 : index
    %c0_37 = arith.constant 0 : index
    %91 = vector.load %arg3[%c128, %c0_37] : memref<160x32xf32, #tpu.memory_space<vmem>>, vector<32x8xf32>
    %cst_38 = arith.constant dense<0.000000e+00> : vector<64x8xf32>
    %92 = tpu.matmul %90, %91, %cst_38 {dimension_numbers = #tpu.dot_dimension_numbers<[1], [0], [0], [1], [0, 0, 1, 1], [], []>} : vector<64x32xf32>, vector<32x8xf32>, vector<64x8xf32> -> vector<64x8xf32>
    %c6 = arith.constant 6 : index
    %c0_39 = arith.constant 0 : index
    %93 = vector.load %arg4[%c6, %c0_39] : memref<16x512xf32, #tpu.memory_space<vmem>>, vector<1x8xf32>
    %c7 = arith.constant 7 : index
    %c0_40 = arith.constant 0 : index
    %94 = vector.load %arg4[%c7, %c0_40] : memref<16x512xf32, #tpu.memory_space<vmem>>, vector<1x8xf32>
    %cst_41 = arith.constant dense<0.000000e+00> : vector<8xf32>
    %95 = vector.multi_reduction <add>, %92, %cst_41 [0] : vector<64x8xf32> to vector<8xf32>
    %96 = vector.shape_cast %95 : vector<8xf32> to vector<1x8xf32>
    %97 = arith.mulf %92, %92 : vector<64x8xf32>
    %cst_42 = arith.constant dense<0.000000e+00> : vector<8xf32>
    %98 = vector.multi_reduction <add>, %97, %cst_42 [0] : vector<64x8xf32> to vector<8xf32>
    %99 = vector.shape_cast %98 : vector<8xf32> to vector<1x8xf32>
    %cst_43 = arith.constant 1.562500e-02 : f32
    %100 = vector.broadcast %cst_43 : f32 to vector<1x8xf32>
    %101 = arith.mulf %96, %100 : vector<1x8xf32>
    %cst_44 = arith.constant 1.562500e-02 : f32
    %102 = vector.broadcast %cst_44 : f32 to vector<1x8xf32>
    %103 = arith.mulf %99, %102 : vector<1x8xf32>
    %104 = arith.mulf %101, %101 : vector<1x8xf32>
    %105 = arith.subf %103, %104 : vector<1x8xf32>
    %cst_45 = arith.constant 0.000000e+00 : f32
    %106 = vector.broadcast %cst_45 : f32 to vector<1x8xf32>
    %107 = arith.maximumf %105, %106 : vector<1x8xf32>
    %cst_46 = arith.constant 9.99999974E-6 : f32
    %108 = vector.broadcast %cst_46 : f32 to vector<1x8xf32>
    %109 = arith.addf %107, %108 : vector<1x8xf32>
    %110 = math.rsqrt %109 : vector<1x8xf32>
    %111 = arith.mulf %93, %110 : vector<1x8xf32>
    %112 = arith.mulf %101, %111 : vector<1x8xf32>
    %113 = arith.subf %94, %112 : vector<1x8xf32>
    %114 = vector.broadcast %111 : vector<1x8xf32> to vector<64x8xf32>
    %115 = arith.mulf %92, %114 : vector<64x8xf32>
    %116 = vector.broadcast %113 : vector<1x8xf32> to vector<64x8xf32>
    %117 = arith.addf %115, %116 : vector<64x8xf32>
    %cst_47 = arith.constant 2.000000e-01 : f32
    %118 = vector.broadcast %cst_47 : f32 to vector<64x8xf32>
    %119 = arith.mulf %118, %117 : vector<64x8xf32>
    %120 = arith.maximumf %117, %119 : vector<64x8xf32>
    %c8 = arith.constant 8 : index
    %c0_48 = arith.constant 0 : index
    %121 = vector.load %arg4[%c8, %c0_48] : memref<16x512xf32, #tpu.memory_space<vmem>>, vector<1x8xf32>
    %c9 = arith.constant 9 : index
    %c0_49 = arith.constant 0 : index
    %122 = vector.load %arg4[%c9, %c0_49] : memref<16x512xf32, #tpu.memory_space<vmem>>, vector<1x1xf32>
    %123 = vector.broadcast %121 : vector<1x8xf32> to vector<64x8xf32>
    %124 = arith.mulf %120, %123 : vector<64x8xf32>
    %cst_50 = arith.constant dense<0.000000e+00> : vector<64xf32>
    %125 = vector.multi_reduction <add>, %124, %cst_50 [1] : vector<64x8xf32> to vector<64xf32>
    %126 = vector.shape_cast %125 : vector<64xf32> to vector<64x1xf32>
    %127 = vector.broadcast %122 : vector<1x1xf32> to vector<64x1xf32>
    %128 = arith.addf %126, %127 : vector<64x1xf32>
    %cst_51 = arith.constant 0.000000e+00 : f32
    %129 = vector.broadcast %cst_51 : f32 to vector<64x1xf32>
    %130 = arith.subf %129, %128 : vector<64x1xf32>
    %131 = math.exp %130 : vector<64x1xf32>
    %cst_52 = arith.constant 1.000000e+00 : f32
    %132 = vector.broadcast %cst_52 : f32 to vector<64x1xf32>
    %133 = arith.addf %132, %131 : vector<64x1xf32>
    %134 = tpu.reciprocal %133 {approx = true} : vector<64x1xf32> -> vector<64x1xf32>
    %c0_53 = arith.constant 0 : index
    %c0_54 = arith.constant 0 : index
    %135 = vector.load %arg5[%c0_53, %c0_54] : memref<64x1xf32, #tpu.memory_space<vmem>>, vector<64x1xf32>
    tpu.vector_store %arg5[%c0_53, %c0_54], %134 {strides = array<i32>} : memref<64x1xf32, #tpu.memory_space<vmem>>, vector<64x1xf32>,
    return
  }
}

</mosaic_0001>

<bundles_post_ra>
// kernel: tpu_custom_call.1
= control target key start
LH: loop header
LB: loop body
LE: loop exit
PB: predicated region body
PF: predicated region fallthrough
CT: control target
= control target key end

     0   :  { %10 = vsyncpa [#allocation3], 0  ;;  %s2607_s0 = inlined_call_operand.vmem [shape: f32[64,64], index: 0, kind: input, shape index: {}]   ;;  %s2608_s1 = inlined_call_operand.hbm [shape: f32[64,512], index: 1, kind: input, shape index: {}]   ;;  %s2609_s2 = inlined_call_operand.hbm [shape: f32[512,128], index: 2, kind: input, shape index: {}]   ;;  %s2610_s3 = inlined_call_operand.vmem [shape: f32[160,32], index: 3, kind: input, shape index: {}]   ;;  %s2611_s4 = inlined_call_operand.vmem [shape: f32[16,512], index: 4, kind: input, shape index: {}]   ;;  %s2612_s5 = inlined_call_operand.vmem [shape: f32[64,1], index: 5, kind: output, shape index: {}]  }
   0x1   :  { %11 = vsyncpa [#allocation5], 0  ;;  %s1968_s18 = smov [#allocation2]  }
   0x2   :  { %s19_s19 = sshll.u32 %s1968_s18, 4  ;;  %s20_s19 = int_to_ptr.vmem [resolvable:$true] %s19_s19 }
   0x3   :  { %s1932_s20 = scalar_lea.vmem %s20_s19, 4096  ;;  %p1937_p1 = scmp.lt.s32.totalorder %s20_s19, %s20_s19 }
   0x4   :  { %p1933_p0 = scmp.ne.s32.totalorder %s20_s19, %s1932_s20  ;;  %p1938_p2 = scmp.lt.s32.totalorder %s1932_s20, %s1932_s20 }
   0x6   :  { %p1939_p3 = por %p1938_p2, %p1937_p1 }
   0x8   :  { %p1940_p4 = pnand %p1939_p3, %p1933_p0 }
   0xa   :  { %1943 = shalt.err (!%p1940_p4)
}
   0xb   :  { %s1969_s21 = smov 512   ;;  %s1970_s22 = smov 32  }
   0xc   :  { %25 = dma.hbm_to_vmem [thread:$0]  %s2608_s1, 4096, %s20_s19, [#allocation3], %s1969_s21, %s1969_s21, %s1970_s22  }
   0xd   :  { %s1971_s25 = smov [#allocation4]  }
   0xe   :  { %s31_s26 = sshll.u32 %s1971_s25, 4  ;;  %s32_s26 = int_to_ptr.vmem [resolvable:$true] %s31_s26 }
   0xf   :  { %s1952_s27 = scalar_lea.vmem %s32_s26, 8192  ;;  %p1957_p6 = scmp.lt.s32.totalorder %s32_s26, %s32_s26 }
  0x10   :  { %p1953_p5 = scmp.ne.s32.totalorder %s32_s26, %s1952_s27  ;;  %p1958_p7 = scmp.lt.s32.totalorder %s1952_s27, %s1952_s27 }
  0x12   :  { %p1959_p8 = por %p1958_p7, %p1957_p6 }
  0x14   :  { %p1960_p9 = pnand %p1959_p8, %p1953_p5 }
  0x16   :  { %1963 = shalt.err (!%p1960_p9)
}
  0x17   :  { %s1972_s28 = smov 128   ;;  %s1973_s29 = smov 8  }
  0x18   :  { %37 = dma.hbm_to_vmem [thread:$0]  %s2609_s2, 8192, %s32_s26, [#allocation5], %s1972_s28, %s1972_s28, %s1973_s29  }
  0x19   :  { %1964 = dma.done.wait [#allocation3], 4096  }
  0x1a   :  { %1965 = vsyncadd [#allocation3], 4294963200 }
  0x1b   :  { %1966 = dma.done.wait [#allocation5], 8192  }
  0x1c   :  { %1967 = vsyncadd [#allocation5], 4294959104  ;;  %v1974_v0 = vmov 0.0   ;;  %v85_v1 = vld [vmem:[#allocation2 + $0xe8] sm:$0xff]  ;;  %v87_v2 = vld [vmem:[#allocation2 + $0xf8] sm:$0xff]  ;;  %vm88_vm0 = vcmask 523264  }
  0x1d   :  { %177 = vmatprep.mubr.f32.mxu0 %v1974_v0  ;;  %290 = vmatprep.mubr.f32.mxu1 %v1974_v0  ;;  %v84_v3 = vld [vmem:[#allocation2 + $0xe0] sm:$0xff]  ;;  %v86_v4 = vld [vmem:[#allocation2 + $0xf0] sm:$0xff]  ;;  %v81_v5 = vld [vmem:[#allocation2 + $0xc8] sm:$0xff]  ;;  %vm1215_vm1 = vcmask 261120   ;;  %vm1443_vm2 = vcmask 64512   ;;  %vm1618_vm3 = vcmask 7168  }
  0x1e   :  { %129 = vmatprep.subr.mxu0 %v85_v1  ;;  %242 = vmatprep.subr.mxu1 %v87_v2  ;;  %v83_v6 = vld [vmem:[#allocation2 + $0xd8] sm:$0xff]  ;;  %v80_v7 = vld [vmem:[#allocation2 + $0xc0] sm:$0xff]  ;;  %v82_v8 = vld [vmem:[#allocation2 + $0xd0] sm:$0xff] }
  0x1f   :  { %130 = vmatpush1.msra.mxu0 %v84_v3  ;;  %243 = vmatpush1.msra.mxu1 %v86_v4  ;;  %v77_v9 = vld [vmem:[#allocation2 + $0xa8] sm:$0xff]  ;;  %v79_v10 = vld [vmem:[#allocation2 + $0xb8] sm:$0xff]  ;;  %v76_v11 = vld [vmem:[#allocation2 + $0xa0] sm:$0xff] }
  0x20   :  { %131 = vmatprep.subr.mxu0 %v81_v5  ;;  %244 = vmatprep.subr.mxu1 %v83_v6  ;;  %v78_v12 = vld [vmem:[#allocation2 + $0xb0] sm:$0xff]  ;;  %v73_v13 = vld [vmem:[#allocation2 + $0x88] sm:$0xff]  ;;  %v75_v14 = vld [vmem:[#allocation2 + $0x98] sm:$0xff] }
  0x21   :  { %132 = vmatpush1.msra.mxu0 %v80_v7  ;;  %245 = vmatpush1.msra.mxu1 %v82_v8  ;;  %v72_v15 = vld [vmem:[#allocation2 + $0x80] sm:$0xff]  ;;  %v74_v16 = vld [vmem:[#allocation2 + $0x90] sm:$0xff]  ;;  %v69_v17 = vld [vmem:[#allocation2 + $0x68] sm:$0xff] }
  0x22   :  { %133 = vmatprep.subr.mxu0 %v77_v9  ;;  %246 = vmatprep.subr.mxu1 %v79_v10  ;;  %v71_v18 = vld [vmem:[#allocation2 + $0x78] sm:$0xff]  ;;  %v68_v19 = vld [vmem:[#allocation2 + $0x60] sm:$0xff]  ;;  %v70_v20 = vld [vmem:[#allocation2 + $0x70] sm:$0xff] }
  0x23   :  { %134 = vmatpush1.msra.mxu0 %v76_v11  ;;  %247 = vmatpush1.msra.mxu1 %v78_v12  ;;  %v65_v21 = vld [vmem:[#allocation2 + $0x48] sm:$0xff]  ;;  %v67_v22 = vld [vmem:[#allocation2 + $0x58] sm:$0xff]  ;;  %v64_v23 = vld [vmem:[#allocation2 + $0x40] sm:$0xff] }
  0x24   :  { %135 = vmatprep.subr.mxu0 %v73_v13  ;;  %248 = vmatprep.subr.mxu1 %v75_v14  ;;  %v66_v24 = vld [vmem:[#allocation2 + $0x50] sm:$0xff]  ;;  %v61_v25 = vld [vmem:[#allocation2 + $0x28] sm:$0xff]  ;;  %v63_v26 = vld [vmem:[#allocation2 + $0x38] sm:$0xff] }
  0x25   :  { %136 = vmatpush1.msra.mxu0 %v72_v15  ;;  %249 = vmatpush1.msra.mxu1 %v74_v16  ;;  %v60_v27 = vld [vmem:[#allocation2 + $0x20] sm:$0xff]  ;;  %v62_v28 = vld [vmem:[#allocation2 + $0x30] sm:$0xff]  ;;  %v57_v29 = vld [vmem:[#allocation2 + $0x8] sm:$0xff] }
  0x26   :  { %137 = vmatprep.subr.mxu0 %v69_v17  ;;  %250 = vmatprep.subr.mxu1 %v71_v18  ;;  %v59_v30 = vld [vmem:[#allocation2 + $0x18] sm:$0xff]  ;;  %v56_v31 = vld [vmem:[#allocation2] sm:$0xff]  ;;  %v58_v32 = vld [vmem:[#allocation2 + $0x10] sm:$0xff] }
  0x27   :  { %138 = vmatpush1.msra.mxu0 %v68_v19  ;;  %251 = vmatpush1.msra.mxu1 %v70_v20  ;;  %v48_v33 = vld [vmem:[%s2607_s0] sm:$0xff]  ;;  %v49_v34 = vld [vmem:[%s2607_s0 + $0x8] sm:$0xff]  ;;  %v50_v35 = vld [vmem:[%s2607_s0 + $0x10] sm:$0xff] }
  0x28   :  { %139 = vmatprep.subr.mxu0 %v65_v21  ;;  %252 = vmatprep.subr.mxu1 %v67_v22  ;;  %v51_v36 = vld [vmem:[%s2607_s0 + $0x18] sm:$0xff]  ;;  %v52_v37 = vld [vmem:[%s2607_s0 + $0x20] sm:$0xff]  ;;  %v53_v38 = vld [vmem:[%s2607_s0 + $0x28] sm:$0xff] }
  0x29   :  { %140 = vmatpush1.msra.mxu0 %v64_v23  ;;  %253 = vmatpush1.msra.mxu1 %v66_v24  ;;  %v54_v39 = vld [vmem:[%s2607_s0 + $0x30] sm:$0xff]  ;;  %v55_v40 = vld [vmem:[%s2607_s0 + $0x38] sm:$0xff]  ;;  %v769_v49 = vld [vmem:[#allocation4 + $0xe8] sm:$0xff] }
  0x2a   :  { %141 = vmatprep.subr.mxu0 %v61_v25  ;;  %254 = vmatprep.subr.mxu1 %v63_v26  ;;  %v771_v41 = vld [vmem:[#allocation4 + $0xf8] sm:$0xff]  ;;  %v770_v45 = vld [vmem:[#allocation4 + $0xf0] sm:$0xff]  ;;  %v801_v50 = vld [vmem:[#allocation4 + $0x1e8] sm:$0xff] }
  0x2b   :  { %142 = vmatpush1.msra.mxu0 %v60_v27  ;;  %255 = vmatpush1.msra.mxu1 %v62_v28  ;;  %v803_v42 = vld [vmem:[#allocation4 + $0x1f8] sm:$0xff]  ;;  %v802_v46 = vld [vmem:[#allocation4 + $0x1f0] sm:$0xff]  ;;  %v753_v51 = vld [vmem:[#allocation4 + $0x68] sm:$0xff] }
  0x2c   :  { %143 = vmatprep.subr.mxu0 %v57_v29  ;;  %256 = vmatprep.subr.mxu1 %v59_v30  ;;  %v755_v43 = vld [vmem:[#allocation4 + $0x78] sm:$0xff]  ;;  %v754_v47 = vld [vmem:[#allocation4 + $0x70] sm:$0xff]  ;;  %v785_v52 = vld [vmem:[#allocation4 + $0x168] sm:$0xff] }
  0x2d   :  { %144 = vmatpush1.msra.mxu0 %v56_v31  ;;  %257 = vmatpush1.msra.mxu1 %v58_v32  ;;  %v787_v44 = vld [vmem:[#allocation4 + $0x178] sm:$0xff]  ;;  %v786_v48 = vld [vmem:[#allocation4 + $0x170] sm:$0xff]  ;;  %v768_v53 = vld [vmem:[#allocation4 + $0xe0] sm:$0xff] }
  0x2e   :  { %1633 = vmatmul.mubr.msk.f32.vlgmr.msra.gmra.mxu0 %vm88_vm0, %v48_v33  ;;  %1641 = vmatmul.mubr.msk.f32.vlgmr.msra.gmra.mxu1 %vm88_vm0, %v48_v33  ;;  %v800_v54 = vld [vmem:[#allocation4 + $0x1e0] sm:$0xff]  ;;  %v767_v57 = vld [vmem:[#allocation4 + $0xd8] sm:$0xff]  ;;  %v766_v61 = vld [vmem:[#allocation4 + $0xd0] sm:$0xff] }
  0x2f   :  { %183 = vmatprep.mubr.f32.mxu0 %v1974_v0  ;;  %296 = vmatprep.mubr.f32.mxu1 %v1974_v0  ;;  %v752_v55 = vld [vmem:[#allocation4 + $0x60] sm:$0xff]  ;;  %v799_v58 = vld [vmem:[#allocation4 + $0x1d8] sm:$0xff]  ;;  %v798_v62 = vld [vmem:[#allocation4 + $0x1d0] sm:$0xff] }
  0x30   :  { %1658 = vmatprep.subr.mxu0 %v771_v41  ;;  %1714 = vmatprep.subr.mxu1 %v803_v42  ;;  %v784_v56 = vld [vmem:[#allocation4 + $0x160] sm:$0xff]  ;;  %v751_v59 = vld [vmem:[#allocation4 + $0x58] sm:$0xff]  ;;  %v750_v63 = vld [vmem:[#allocation4 + $0x50] sm:$0xff] }
  0x31   :  { %1659 = vmatpush3.msra.mxu0 %v755_v43  ;;  %1715 = vmatpush3.msra.mxu1 %v787_v44  ;;  %v783_v60 = vld [vmem:[#allocation4 + $0x158] sm:$0xff]  ;;  %v765_v1 = vld [vmem:[#allocation4 + $0xc8] sm:$0xff]  ;;  %v764_v5 = vld [vmem:[#allocation4 + $0xc0] sm:$0xff] }
  0x32   :  { %1634 = vmatmul.mubr.msk.f32.gmra.mxu0 %vm88_vm0, %v49_v34  ;;  %1642 = vmatmul.mubr.msk.f32.gmra.mxu1 %vm88_vm0, %v49_v34  ;;  %v797_v2 = vld [vmem:[#allocation4 + $0x1c8] sm:$0xff]  ;;  %v796_v6 = vld [vmem:[#allocation4 + $0x1c0] sm:$0xff]  ;;  %v763_v9 = vld [vmem:[#allocation4 + $0xb8] sm:$0xff] }
  0x33   :  { %189 = vmatprep.mubr.f32.mxu0 %v1974_v0  ;;  %302 = vmatprep.mubr.f32.mxu1 %v1974_v0  ;;  %v749_v3 = vld [vmem:[#allocation4 + $0x48] sm:$0xff]  ;;  %v748_v7 = vld [vmem:[#allocation4 + $0x40] sm:$0xff]  ;;  %v795_v10 = vld [vmem:[#allocation4 + $0x1b8] sm:$0xff] }
  0x34   :  { %1660 = vmatprep.subr.mxu0 %v770_v45  ;;  %1716 = vmatprep.subr.mxu1 %v802_v46  ;;  %v781_v4 = vld [vmem:[#allocation4 + $0x148] sm:$0xff]  ;;  %v780_v8 = vld [vmem:[#allocation4 + $0x140] sm:$0xff]  ;;  %v747_v11 = vld [vmem:[#allocation4 + $0x38] sm:$0xff] }
  0x35   :  { %1661 = vmatpush3.msra.mxu0 %v754_v47  ;;  %1717 = vmatpush3.msra.mxu1 %v786_v48  ;;  %v779_v12 = vld [vmem:[#allocation4 + $0x138] sm:$0xff]  ;;  %v762_v13 = vld [vmem:[#allocation4 + $0xb0] sm:$0xff]  ;;  %v761_v17 = vld [vmem:[#allocation4 + $0xa8] sm:$0xff] }
  0x36   :  { %1635 = vmatmul.mubr.msk.f32.gmra.mxu0 %vm88_vm0, %v50_v35  ;;  %1643 = vmatmul.mubr.msk.f32.gmra.mxu1 %vm88_vm0, %v50_v35  ;;  %v794_v14 = vld [vmem:[#allocation4 + $0x1b0] sm:$0xff]  ;;  %v793_v18 = vld [vmem:[#allocation4 + $0x1a8] sm:$0xff]  ;;  %v760_v21 = vld [vmem:[#allocation4 + $0xa0] sm:$0xff] }
  0x37   :  { %195 = vmatprep.mubr.f32.mxu0 %v1974_v0  ;;  %308 = vmatprep.mubr.f32.mxu1 %v1974_v0  ;;  %v746_v15 = vld [vmem:[#allocation4 + $0x30] sm:$0xff]  ;;  %v745_v19 = vld [vmem:[#allocation4 + $0x28] sm:$0xff]  ;;  %v792_v22 = vld [vmem:[#allocation4 + $0x1a0] sm:$0xff] }
  0x38   :  { %1662 = vmatprep.subr.mxu0 %v769_v49  ;;  %1718 = vmatprep.subr.mxu1 %v801_v50  ;;  %v778_v16 = vld [vmem:[#allocation4 + $0x130] sm:$0xff]  ;;  %v777_v20 = vld [vmem:[#allocation4 + $0x128] sm:$0xff]  ;;  %v744_v23 = vld [vmem:[#allocation4 + $0x20] sm:$0xff] }
  0x39   :  { %1663 = vmatpush3.msra.mxu0 %v753_v51  ;;  %1719 = vmatpush3.msra.mxu1 %v785_v52  ;;  %v776_v24 = vld [vmem:[#allocation4 + $0x120] sm:$0xff]  ;;  %v759_v25 = vld [vmem:[#allocation4 + $0x98] sm:$0xff]  ;;  %v758_v29 = vld [vmem:[#allocation4 + $0x90] sm:$0xff] }
  0x3a   :  { %1636 = vmatmul.mubr.msk.f32.gmra.mxu0 %vm88_vm0, %v51_v36  ;;  %1644 = vmatmul.mubr.msk.f32.gmra.mxu1 %vm88_vm0, %v51_v36  ;;  %v791_v26 = vld [vmem:[#allocation4 + $0x198] sm:$0xff]  ;;  %v790_v30 = vld [vmem:[#allocation4 + $0x190] sm:$0xff]  ;;  %v757_v33 = vld [vmem:[#allocation4 + $0x88] sm:$0xff] }
  0x3b   :  { %201 = vmatprep.mubr.f32.mxu0 %v1974_v0  ;;  %314 = vmatprep.mubr.f32.mxu1 %v1974_v0  ;;  %v743_v27 = vld [vmem:[#allocation4 + $0x18] sm:$0xff]  ;;  %v742_v31 = vld [vmem:[#allocation4 + $0x10] sm:$0xff]  ;;  %v789_v34 = vld [vmem:[#allocation4 + $0x188] sm:$0xff] }
  0x3c   :  { %1664 = vmatprep.subr.mxu0 %v768_v53  ;;  %1720 = vmatprep.subr.mxu1 %v800_v54  ;;  %v775_v28 = vld [vmem:[#allocation4 + $0x118] sm:$0xff]  ;;  %v774_v32 = vld [vmem:[#allocation4 + $0x110] sm:$0xff]  ;;  %v741_v35 = vld [vmem:[#allocation4 + $0x8] sm:$0xff] }
  0x3d   :  { %1665 = vmatpush3.msra.mxu0 %v752_v55  ;;  %1721 = vmatpush3.msra.mxu1 %v784_v56  ;;  %v773_v36 = vld [vmem:[#allocation4 + $0x108] sm:$0xff] }
  0x3e   :  { %1637 = vmatmul.mubr.msk.f32.gmra.mxu0 %vm88_vm0, %v52_v37  ;;  %1645 = vmatmul.mubr.msk.f32.gmra.mxu1 %vm88_vm0, %v52_v37  ;;  %v756_v37 = vld [vmem:[#allocation4 + $0x80] sm:$0xff] }
  0x3f   :  { %207 = vmatprep.mubr.f32.mxu0 %v1974_v0  ;;  %320 = vmatprep.mubr.f32.mxu1 %v1974_v0 }
  0x40   :  { %1666 = vmatprep.subr.mxu0 %v767_v57  ;;  %1722 = vmatprep.subr.mxu1 %v799_v58 }
  0x41   :  { %1667 = vmatpush3.msra.mxu0 %v751_v59  ;;  %1723 = vmatpush3.msra.mxu1 %v783_v60 }
  0x42   :  { %1638 = vmatmul.mubr.msk.f32.gmra.mxu0 %vm88_vm0, %v53_v38  ;;  %1646 = vmatmul.mubr.msk.f32.gmra.mxu1 %vm88_vm0, %v53_v38  ;;  %v788_v38 = vld [vmem:[#allocation4 + $0x180] sm:$0xff] }
  0x43   :  { %213 = vmatprep.mubr.f32.mxu0 %v1974_v0  ;;  %326 = vmatprep.mubr.f32.mxu1 %v1974_v0 }
  0x44   :  { %1668 = vmatprep.subr.mxu0 %v766_v61  ;;  %1724 = vmatprep.subr.mxu1 %v798_v62 }
  0x45   :  { %1669 = vmatpush3.msra.mxu0 %v750_v63 }
  0x46   :  { %1639 = vmatmul.mubr.msk.f32.gmra.mxu0 %vm88_vm0, %v54_v39  ;;  %1647 = vmatmul.mubr.msk.f32.gmra.mxu1 %vm88_vm0, %v54_v39  ;;  %v740_v39 = vld [vmem:[#allocation4] sm:$0xff] }
  0x47   :  { %219 = vmatprep.mubr.f32.mxu0 %v1974_v0  ;;  %332 = vmatprep.mubr.f32.mxu1 %v1974_v0  ;;  %v782_v0 = vld [vmem:[#allocation4 + $0x150] sm:$0xff] }
  0x48   :  { %1725 = vmatpush3.msra.mxu1 %v782_v0  ;;  %1670 = vmatprep.subr.mxu0 %v765_v1 }
  0x49   :  { %1726 = vmatprep.subr.mxu1 %v797_v2  ;;  %1671 = vmatpush3.msra.mxu0 %v749_v3 }
  0x4a   :  { %1640 = vmatmul.mubr.msk.f32.gmra.mxu0 %vm88_vm0, %v55_v40  ;;  %1648 = vmatmul.mubr.msk.f32.gmra.mxu1 %vm88_vm0, %v55_v40  ;;  %v772_v40 = vld [vmem:[#allocation4 + $0x100] sm:$0xff] }
  0x4b   :  { %1727 = vmatpush3.msra.mxu1 %v781_v4  ;;  %1672 = vmatprep.subr.mxu0 %v764_v5 }
  0x4c   :  { %1728 = vmatprep.subr.mxu1 %v796_v6  ;;  %1673 = vmatpush3.msra.mxu0 %v748_v7 }
  0x4d   :  { %1729 = vmatpush3.msra.mxu1 %v780_v8  ;;  %1674 = vmatprep.subr.mxu0 %v763_v9 }
  0x4e   :  { %1730 = vmatprep.subr.mxu1 %v795_v10  ;;  %1675 = vmatpush3.msra.mxu0 %v747_v11 }
  0x4f   :  { %1731 = vmatpush3.msra.mxu1 %v779_v12  ;;  %1676 = vmatprep.subr.mxu0 %v762_v13 }
  0x50   :  { %1732 = vmatprep.subr.mxu1 %v794_v14  ;;  %1677 = vmatpush3.msra.mxu0 %v746_v15 }
  0x51   :  { %1733 = vmatpush3.msra.mxu1 %v778_v16  ;;  %1678 = vmatprep.subr.mxu0 %v761_v17 }
  0x52   :  { %1734 = vmatprep.subr.mxu1 %v793_v18  ;;  %1679 = vmatpush3.msra.mxu0 %v745_v19 }
  0x53   :  { %1735 = vmatpush3.msra.mxu1 %v777_v20  ;;  %1680 = vmatprep.subr.mxu0 %v760_v21 }
  0x54   :  { %1736 = vmatprep.subr.mxu1 %v792_v22  ;;  %1681 = vmatpush3.msra.mxu0 %v744_v23 }
  0x55   :  { %1737 = vmatpush3.msra.mxu1 %v776_v24  ;;  %1682 = vmatprep.subr.mxu0 %v759_v25 }
  0x56   :  { %1738 = vmatprep.subr.mxu1 %v791_v26  ;;  %1683 = vmatpush3.msra.mxu0 %v743_v27 }
  0x57   :  { %1739 = vmatpush3.msra.mxu1 %v775_v28  ;;  %1684 = vmatprep.subr.mxu0 %v758_v29 }
  0x58   :  { %1740 = vmatprep.subr.mxu1 %v790_v30  ;;  %1685 = vmatpush3.msra.mxu0 %v742_v31 }
  0x59   :  { %1741 = vmatpush3.msra.mxu1 %v774_v32  ;;  %1686 = vmatprep.subr.mxu0 %v757_v33 }
  0x5a   :  { %1742 = vmatprep.subr.mxu1 %v789_v34  ;;  %1687 = vmatpush3.msra.mxu0 %v741_v35 }
  0x5b   :  { %1743 = vmatpush3.msra.mxu1 %v773_v36  ;;  %1688 = vmatprep.subr.mxu0 %v756_v37 }
  0x5c   :  { %1744 = vmatprep.subr.mxu1 %v788_v38  ;;  %1689 = vmatpush3.msra.mxu0 %v740_v39 }
  0x5d   :  { %1745 = vmatpush3.msra.mxu1 %v772_v40 }
  0xee   :  { %v2068_v41 = vpop.f32.mrf.mxu0  ;;  %v2070_v42 = vpop.f32.mrf.mxu1 }
  0xef   :  { %v394_v55 = vmul.f32 %v2068_v41, %v2068_v41  ;;  %v396_v57 = vmul.f32 %v2070_v42, %v2070_v42 }
  0xf0   :  { %v2072_v43 = vpop.f32.mrf.mxu0  ;;  %v2074_v44 = vpop.f32.mrf.mxu1 }
  0xf1   :  { %v395_v58 = vmul.f32 %v2072_v43, %v2072_v43  ;;  %v397_v63 = vmul.f32 %v2074_v44, %v2074_v44 }
  0xf2   :  { %v2076_v45 = vpop.f32.mrf.mxu0  ;;  %v2078_v46 = vpop.f32.mrf.mxu1 }
  0xf3   :  { %v398_v51 = vmul.f32 %v2076_v45, %v2076_v45  ;;  %v400_v52 = vmul.f32 %v2078_v46, %v2078_v46  ;;  %v342_v0 = vadd.f32 %v2076_v45, %v2068_v41  ;;  %v368_v2 = vadd.f32 %v2078_v46, %v2070_v42 }
  0xf4   :  { %v2080_v47 = vpop.f32.mrf.mxu0  ;;  %v2082_v48 = vpop.f32.mrf.mxu1 }
  0xf5   :  { %v399_v56 = vmul.f32 %v2080_v47, %v2080_v47  ;;  %v401_v59 = vmul.f32 %v2082_v48, %v2082_v48  ;;  %v426_v1 = vadd.f32 %v398_v51, %v394_v55  ;;  %v452_v3 = vadd.f32 %v400_v52, %v396_v57 }
  0xf6   :  { %v2084_v49 = vpop.f32.mrf.mxu0  ;;  %v2086_v50 = vpop.f32.mrf.mxu1  ;;  %v355_v4 = vadd.f32 %v2080_v47, %v2072_v43  ;;  %v381_v10 = vadd.f32 %v2082_v48, %v2074_v44 }
  0xf7   :  { %v402_v60 = vmul.f32 %v2084_v49, %v2084_v49  ;;  %v404_v5 = vmul.f32 %v2086_v50, %v2086_v50  ;;  %v439_v9 = vadd.f32 %v399_v56, %v395_v58  ;;  %v465_v13 = vadd.f32 %v401_v59, %v397_v63 }
  0xf8   :  { %v2092_v53 = vpop.f32.mrf.mxu0  ;;  %v2094_v54 = vpop.f32.mrf.mxu1  ;;  %v343_v14 = vadd.f32 %v342_v0, %v2084_v49  ;;  %v369_v16 = vadd.f32 %v368_v2, %v2086_v50 }
  0xf9   :  { %v403_v6 = vmul.f32 %v2092_v53, %v2092_v53  ;;  %v405_v11 = vmul.f32 %v2094_v54, %v2094_v54  ;;  %v427_v15 = vadd.f32 %v426_v1, %v402_v60  ;;  %v356_v19 = vadd.f32 %v355_v4, %v2092_v53 }
  0xfa   :  { %v2108_v61 = vpop.f32.mrf.mxu0  ;;  %v2110_v62 = vpop.f32.mrf.mxu1  ;;  %v382_v20 = vadd.f32 %v381_v10, %v2094_v54  ;;  %v453_v23 = vadd.f32 %v452_v3, %v404_v5 }
  0xfb   :  { %v406_v12 = vmul.f32 %v2108_v61, %v2108_v61  ;;  %v408_v21 = vmul.f32 %v2110_v62, %v2110_v62  ;;  %v440_v24 = vadd.f32 %v439_v9, %v403_v6  ;;  %v344_v25 = vadd.f32 %v343_v14, %v2108_v61 }
  0xfc   :  { %v2124_v7 = vpop.f32.mrf.mxu0  ;;  %v2126_v8 = vpop.f32.mrf.mxu1  ;;  %v466_v29 = vadd.f32 %v465_v13, %v405_v11  ;;  %v370_v31 = vadd.f32 %v369_v16, %v2110_v62 }
  0xfd   :  { %v407_v22 = vmul.f32 %v2124_v7, %v2124_v7  ;;  %v409_v26 = vmul.f32 %v2126_v8, %v2126_v8  ;;  %v428_v30 = vadd.f32 %v427_v15, %v406_v12  ;;  %v357_v33 = vadd.f32 %v356_v19, %v2124_v7 }
  0xfe   :  { %v2136_v17 = vpop.f32.mrf.mxu0  ;;  %v2138_v18 = vpop.f32.mrf.mxu1  ;;  %v383_v34 = vadd.f32 %v382_v20, %v2126_v8  ;;  %v454_v39 = vadd.f32 %v453_v23, %v408_v21 }
  0xff   :  { %v410_v32 = vmul.f32 %v2136_v17, %v2136_v17  ;;  %v412_v35 = vmul.f32 %v2138_v18, %v2138_v18  ;;  %v441_v40 = vadd.f32 %v440_v24, %v407_v22  ;;  %v467_v55 = vadd.f32 %v466_v29, %v409_v26 }
 0x100   :  { %v2149_v27 = vpop.f32.mrf.mxu0  ;;  %v2151_v28 = vpop.f32.mrf.mxu1  ;;  %v345_v56 = vadd.f32 %v344_v25, %v2136_v17  ;;  %v371_v57 = vadd.f32 %v370_v31, %v2138_v18 }
 0x101   :  { %v411_v36 = vmul.f32 %v2149_v27, %v2149_v27  ;;  %v413_v51 = vmul.f32 %v2151_v28, %v2151_v28  ;;  %v429_v63 = vadd.f32 %v428_v30, %v410_v32  ;;  %v358_v0 = vadd.f32 %v357_v33, %v2149_v27 }
 0x102   :  { %v2162_v37 = vpop.f32.mrf.mxu0  ;;  %v2164_v38 = vpop.f32.mrf.mxu1  ;;  %v384_v1 = vadd.f32 %v383_v34, %v2151_v28  ;;  %v455_v3 = vadd.f32 %v454_v39, %v412_v35 }
 0x103   :  { %v414_v52 = vmul.f32 %v2162_v37, %v2162_v37  ;;  %v416_v58 = vmul.f32 %v2164_v38, %v2164_v38  ;;  %v442_v4 = vadd.f32 %v441_v40, %v411_v36  ;;  %v346_v5 = vadd.f32 %v345_v56, %v2162_v37 }
 0x104   :  { %v2174_v59 = vpop.f32.mrf.mxu0  ;;  %v2176_v60 = vpop.f32.mrf.mxu1  ;;  %v468_v11 = vadd.f32 %v467_v55, %v413_v51  ;;  %v372_v13 = vadd.f32 %v371_v57, %v2164_v38 }
 0x105   :  { %v415_v2 = vmul.f32 %v2174_v59, %v2174_v59  ;;  %v417_v6 = vmul.f32 %v2176_v60, %v2176_v60  ;;  %v430_v12 = vadd.f32 %v429_v63, %v414_v52  ;;  %v456_v15 = vadd.f32 %v455_v3, %v416_v58 }
 0x106   :  { %v2185_v9 = vpop.f32.mrf.mxu0  ;;  %v2187_v10 = vpop.f32.mrf.mxu1  ;;  %v359_v16 = vadd.f32 %v358_v0, %v2174_v59  ;;  %v385_v19 = vadd.f32 %v384_v1, %v2176_v60 }
 0x107   :  { %v418_v14 = vmul.f32 %v2185_v9, %v2185_v9  ;;  %v420_v20 = vmul.f32 %v2187_v10, %v2187_v10  ;;  %v443_v23 = vadd.f32 %v442_v4, %v415_v2  ;;  %v347_v24 = vadd.f32 %v346_v5, %v2185_v9 }
 0x108   :  { %v2196_v21 = vpop.f32.mrf.mxu0  ;;  %v2198_v22 = vpop.f32.mrf.mxu1  ;;  %v373_v25 = vadd.f32 %v372_v13, %v2187_v10  ;;  %v469_v29 = vadd.f32 %v468_v11, %v417_v6 }
 0x109   :  { %v419_v26 = vmul.f32 %v2196_v21, %v2196_v21  ;;  %v431_v30 = vadd.f32 %v430_v12, %v418_v14  ;;  %v360_v31 = vadd.f32 %v359_v16, %v2196_v21  ;;  %v421_v32 = vmul.f32 %v2198_v22, %v2198_v22 }
 0x10a   :  { %v2207_v33 = vpop.f32.mrf.mxu0  ;;  %v2209_v34 = vpop.f32.mrf.mxu1  ;;  %v386_v35 = vadd.f32 %v385_v19, %v2198_v22  ;;  %v457_v51 = vadd.f32 %v456_v15, %v420_v20 }
 0x10b   :  { %2614 = vst [vmem:[#allocation8_spill] sm:$0xff] %v2209_v34  ;;  %v348_v36 = vadd.f32 %v347_v24, %v2207_v33  ;;  %v422_v39 = vmul.f32 %v2207_v33, %v2207_v33  ;;  %v374_v40 = vadd.f32 %v373_v25, %v2209_v34  ;;  %v444_v52 = vadd.f32 %v443_v23, %v419_v26 }
 0x10c   :  { %v470_v55 = vadd.f32 %v469_v29, %v421_v32  ;;  %v424_v56 = vmul.f32 %v2209_v34, %v2209_v34  ;;  %v2218_v57 = vpop.f32.mrf.mxu0  ;;  %v2220_v58 = vpop.f32.mrf.mxu1 }
 0x10d   :  { %v349_v63 = vrot.slane %v348_v36, 4  ;;  %v432_v0 = vadd.f32 %v431_v30, %v422_v39  ;;  %v375_v1 = vrot.slane %v374_v40, 4  ;;  %v361_v2 = vadd.f32 %v360_v31, %v2218_v57 }
 0x10e   :  { %v458_v3 = vadd.f32 %v457_v51, %v424_v56  ;;  %v423_v4 = vmul.f32 %v2218_v57, %v2218_v57  ;;  %v387_v5 = vadd.f32 %v386_v35, %v2220_v58  ;;  %v425_v6 = vmul.f32 %v2220_v58, %v2220_v58 }
 0x10f   :  { %v350_v11 = vadd.f32 %v349_v63, %v348_v36  ;;  %v433_v12 = vrot.slane %v432_v0, 4  ;;  %v376_v13 = vadd.f32 %v375_v1, %v374_v40  ;;  %v362_v14 = vrot.slane %v361_v2, 4 }
 0x110   :  { %v459_v15 = vrot.slane %v458_v3, 4  ;;  %v445_v16 = vadd.f32 %v444_v52, %v423_v4  ;;  %v388_v19 = vrot.slane %v387_v5, 4  ;;  %v471_v20 = vadd.f32 %v470_v55, %v425_v6 }
 0x111   :  { %v351_v23 = vrot.slane %v350_v11, 2  ;;  %v434_v24 = vadd.f32 %v433_v12, %v432_v0  ;;  %v377_v25 = vrot.slane %v376_v13, 2  ;;  %v363_v26 = vadd.f32 %v362_v14, %v361_v2 }
 0x112   :  { %v460_v29 = vadd.f32 %v459_v15, %v458_v3  ;;  %v446_v30 = vrot.slane %v445_v16, 4  ;;  %v389_v31 = vadd.f32 %v388_v19, %v387_v5  ;;  %v472_v32 = vrot.slane %v471_v20, 4 }
 0x113   :  { %v352_v35 = vadd.f32 %v351_v23, %v350_v11  ;;  %v435_v39 = vrot.slane %v434_v24, 2  ;;  %v378_v51 = vadd.f32 %v377_v25, %v376_v13  ;;  %v364_v56 = vrot.slane %v363_v26, 2 }
 0x114   :  { %v461_v36 = vrot.slane %v460_v29, 2  ;;  %v447_v63 = vadd.f32 %v446_v30, %v445_v16  ;;  %v390_v40 = vrot.slane %v389_v31, 2  ;;  %v473_v1 = vadd.f32 %v472_v32, %v471_v20 }
 0x115   :  { %v353_v34 = vrot.slane %v352_v35, 1  ;;  %v436_v52 = vadd.f32 %v435_v39, %v434_v24  ;;  %v379_v4 = vrot.slane %v378_v51, 1  ;;  %v365_v55 = vadd.f32 %v364_v56, %v363_v26 }
 0x116   :  { %v462_v6 = vadd.f32 %v461_v36, %v460_v29  ;;  %v448_v0 = vrot.slane %v447_v63, 2  ;;  %v391_v12 = vadd.f32 %v390_v40, %v389_v31  ;;  %v474_v2 = vrot.slane %v473_v1, 2 }
 0x117   :  { %v354_v3 = vadd.f32 %v353_v34, %v352_v35  ;;  %v437_v14 = vrot.slane %v436_v52, 1  ;;  %v380_v5 = vadd.f32 %v379_v4, %v378_v51  ;;  %v366_v15 = vrot.slane %v365_v55, 1 }
 0x118   :  { %v463_v11 = vrot.slane %v462_v6, 1  ;;  %v449_v19 = vadd.f32 %v448_v0, %v447_v63  ;;  %v392_v13 = vrot.slane %v391_v12, 1  ;;  %v475_v23 = vadd.f32 %v474_v2, %v473_v1 }
 0x119   :  { %v438_v25 = vadd.f32 %v437_v14, %v436_v52  ;;  %v478_v16 = vmul.f32 0.015625, %v354_v3  ;;  %v480_v30 = vmul.f32 0.015625, %v380_v5  ;;  %v367_v20 = vadd.f32 %v366_v15, %v365_v55 }
 0x11a   :  { %v464_v32 = vadd.f32 %v463_v11, %v462_v6  ;;  %v450_v24 = vrot.slane %v449_v19, 1  ;;  %v393_v39 = vadd.f32 %v392_v13, %v391_v12  ;;  %v476_v26 = vrot.slane %v475_v23, 1 }
 0x11b   :  { %v482_v29 = vmul.f32 0.015625, %v438_v25  ;;  %v486_v56 = vmul.f32 %v478_v16, %v478_v16  ;;  %v488_v31 = vmul.f32 %v480_v30, %v480_v30  ;;  %v479_v36 = vmul.f32 0.015625, %v367_v20 }
 0x11c   :  { %v484_v34 = vmul.f32 0.015625, %v464_v32  ;;  %v451_v35 = vadd.f32 %v450_v24, %v449_v19  ;;  %v477_v51 = vadd.f32 %v476_v26, %v475_v23  ;;  %v481_v40 = vmul.f32 0.015625, %v393_v39 }
 0x11d   :  { %v490_v4 = vsub.f32 %v482_v29, %v486_v56  ;;  %v487_v63 = vmul.f32 %v479_v36, %v479_v36  ;;  %v1975_v19 = vmov 1966171168   ;;  %v515_v20 = vlaneseq }
 0x11e   :  { %v492_v0 = vsub.f32 %v484_v34, %v488_v31  ;;  %v483_v1 = vmul.f32 0.015625, %v451_v35  ;;  %v485_v52 = vmul.f32 0.015625, %v477_v51  ;;  %v489_v2 = vmul.f32 %v481_v40, %v481_v40 }
 0x11f   :  { %v494_v3 = vmax.f32 %v490_v4, 0.0  ;;  %v513_v23 = vunpack.c.l.s4 %v1975_v19  ;;  %v516_v24 = vshrl.u32 %v515_v20, 7 }
 0x120   :  { %v496_v55 = vmax.f32 %v492_v0, 0.0  ;;  %v491_v6 = vsub.f32 %v483_v1, %v487_v63  ;;  %v493_v14 = vsub.f32 %v485_v52, %v489_v2  ;;  %v339_v0 = vld [vmem:[%s2611_s4] ss:$8 sm:$0xf] }
 0x121   :  { %v498_v12 = vadd.f32 1e-05, %v494_v3  ;;  %v514_v32 = vunpack.c.0.s8 %v513_v23  ;;  %v539_v1 = vsub.s32 0, %v516_v24  ;;  %v543_v2 = vsub.s32 1, %v516_v24 }
 0x122   :  { %v500_v5 = vadd.f32 1e-05, %v496_v55  ;;  %v495_v15 = vmax.f32 %v491_v6, 0.0  ;;  %v497_v11 = vmax.f32 %v493_v14, 0.0  ;;  %v547_v3 = vsub.s32 2, %v516_v24 }
 0x123   :  { %1878 = vrsqrt.f32 %v498_v12  ;;  %v517_v29 = vsub.s32 %v514_v32, %v516_v24  ;;  %v551_v55 = vsub.s32 3, %v516_v24 }
 0x124   :  { %v499_v13 = vadd.f32 1e-05, %v495_v15  ;;  %v501_v25 = vadd.f32 1e-05, %v497_v11  ;;  %1880 = vrsqrt.f32 %v500_v5 }
 0x126   :  { %1882 = vrsqrt.f32 %v499_v13 }
 0x127   :  { %1884 = vrsqrt.f32 %v501_v25 }
 0x130   :  { %v1879_v39 = vpop.eup %1878 }
 0x131   :  { %v1881_v26 = vpop.eup %1880 }
 0x133   :  { %v1883_v56 = vpop.eup %1882 }
 0x134   :  { %v1885_v31 = vpop.eup %1884  ;;  %v510_v34 = vcombine.low %v1879_v39, %v1883_v56 }
 0x135   :  { %v511_v35 = vcombine.low %v1881_v26, %v1885_v31  ;;  %v1649_v26 = vld [vmem:[%s2611_s4 + $0x1] ss:$8 sm:$0xf] }
 0x136   :  { %v518_v51 = vrot.slane %v510_v34, %v517_v29 }
 0x137   :  { %v525_v4 = vrot.slane %v511_v35, %v517_v29 }
 0x139   :  { %v526_v63 = vcombine.low %v518_v51, %v525_v4 }
 0x13b   :  { %v533_v52 = vrot.slane %v526_v63, %v517_v29 }
 0x13d   :  { %v535_v6 = vmul.f32 %v533_v52, %v339_v0 }
 0x13f   :  { %v2231_v14 = vrot.slane %v535_v6, %v539_v1  ;;  %v2233_v12 = vrot.slane %v535_v6, %v543_v2  ;;  %v2235_v5 = vrot.slane %v535_v6, %v547_v3  ;;  %v2237_v15 = vrot.slane %v535_v6, %v551_v55 }
 0x141   :  { %v557_v11 = vmul.f32 %v2231_v14, %v478_v16  ;;  %v558_v13 = vmul.f32 %v2233_v12, %v479_v36  ;;  %v559_v25 = vmul.f32 %v2235_v5, %v480_v30  ;;  %v560_v19 = vmul.f32 %v2237_v15, %v481_v40 }
 0x142   :  { %v592_v56 = vmul.f32 %v2233_v12, %v2072_v43  ;;  %v594_v16 = vmul.f32 %v2237_v15, %v2074_v44  ;;  %v591_v30 = vmul.f32 %v2231_v14, %v2068_v41  ;;  %v593_v40 = vmul.f32 %v2235_v5, %v2070_v42 }
 0x143   :  { %v565_v23 = vcombine.low %v557_v11, %v558_v13  ;;  %v566_v20 = vcombine.low %v559_v25, %v560_v19  ;;  %v596_v31 = vmul.f32 %v2233_v12, %v2080_v47  ;;  %v598_v34 = vmul.f32 %v2237_v15, %v2082_v48 }
 0x144   :  { %v595_v35 = vmul.f32 %v2231_v14, %v2076_v45  ;;  %v597_v43 = vmul.f32 %v2235_v5, %v2078_v46  ;;  %v600_v44 = vmul.f32 %v2233_v12, %v2092_v53  ;;  %v602_v41 = vmul.f32 %v2237_v15, %v2094_v54 }
 0x145   :  { %v573_v32 = vrot.slane %v565_v23, %v517_v29  ;;  %v580_v24 = vrot.slane %v566_v20, %v517_v29  ;;  %v599_v42 = vmul.f32 %v2231_v14, %v2084_v49  ;;  %v601_v47 = vmul.f32 %v2235_v5, %v2086_v50 }
 0x146   :  { %v604_v48 = vmul.f32 %v2233_v12, %v2124_v7  ;;  %v606_v45 = vmul.f32 %v2237_v15, %v2126_v8  ;;  %v603_v46 = vmul.f32 %v2231_v14, %v2108_v61  ;;  %v605_v53 = vmul.f32 %v2235_v5, %v2110_v62 }
 0x147   :  { %v581_v39 = vcombine.low %v573_v32, %v580_v24  ;;  %v608_v50 = vmul.f32 %v2233_v12, %v2149_v27  ;;  %v610_v7 = vmul.f32 %v2237_v15, %v2151_v28  ;;  %v607_v61 = vmul.f32 %v2231_v14, %v2136_v17 }
 0x148   :  { %v2294_v62 = vmul.f32 %v2235_v5, %v2138_v18 }
 0x149   :  { %v588_v36 = vrot.slane %v581_v39, %v517_v29 }
 0x14b   :  { %v590_v29 = vsub.f32 %v1649_v26, %v588_v36  ;;  %v614_v26 = vmul.f32 %v2237_v15, %v2176_v60 }
 0x14d   :  { %v2278_v51 = vrot.slane %v590_v29, %v539_v1  ;;  %v2280_v54 = vrot.slane %v590_v29, %v543_v2  ;;  %v2282_v49 = vrot.slane %v590_v29, %v547_v3  ;;  %v2284_v4 = vrot.slane %v590_v29, %v551_v55 }
 0x14e   :  { %v612_v1 = vmul.f32 %v2233_v12, %v2174_v59 }
 0x14f   :  { %v645_v8 = vadd.f32 %v2280_v54, %v592_v56  ;;  %v647_v63 = vadd.f32 %v2284_v4, %v594_v16  ;;  %v644_v0 = vadd.f32 %v2278_v51, %v591_v30  ;;  %v646_v27 = vadd.f32 %v2282_v49, %v593_v40 }
 0x150   :  { %v649_v28 = vadd.f32 %v2280_v54, %v596_v31  ;;  %v651_v52 = vadd.f32 %v2284_v4, %v598_v34  ;;  %v648_v17 = vadd.f32 %v2278_v51, %v595_v35  ;;  %v650_v55 = vadd.f32 %v2282_v49, %v597_v43 }
 0x151   :  { %v677_v2 = vmul.f32 0.2, %v645_v8  ;;  %v679_v18 = vmul.f32 0.2, %v647_v63  ;;  %v676_v3 = vmul.f32 0.2, %v644_v0  ;;  %v653_v25 = vadd.f32 %v2280_v54, %v600_v44 }
 0x152   :  { %v678_v6 = vmul.f32 0.2, %v646_v27  ;;  %v681_v11 = vmul.f32 0.2, %v649_v28  ;;  %v683_v13 = vmul.f32 0.2, %v651_v52  ;;  %v655_v36 = vadd.f32 %v2284_v4, %v602_v41 }
 0x153   :  { %v709_v19 = vmax.f32 %v645_v8, %v677_v2  ;;  %v711_v59 = vmax.f32 %v647_v63, %v679_v18  ;;  %v708_v23 = vmax.f32 %v644_v0, %v676_v3  ;;  %v680_v20 = vmul.f32 0.2, %v648_v17 }
 0x154   :  { %v710_v32 = vmax.f32 %v646_v27, %v678_v6  ;;  %v713_v24 = vmax.f32 %v649_v28, %v681_v11  ;;  %v682_v39 = vmul.f32 0.2, %v650_v55  ;;  %v715_v56 = vmax.f32 %v651_v52, %v683_v13 }
 0x155   :  { %868 = vmatprep.mubr.f32.mxu0 %v709_v19  ;;  %973 = vmatprep.mubr.f32.mxu1 %v711_v59  ;;  %v685_v16 = vmul.f32 0.2, %v653_v25  ;;  %v652_v30 = vadd.f32 %v2278_v51, %v599_v42  ;;  %v712_v40 = vmax.f32 %v648_v17, %v680_v20  ;;  %v654_v31 = vadd.f32 %v2282_v49, %v601_v47 }
 0x156   :  { %869 = vmatmul.mubr.f32.vlgmr.msra.gmra.mxu0 %v708_v23  ;;  %974 = vmatmul.mubr.f32.vlgmr.msra.gmra.mxu1 %v710_v32  ;;  %v657_v34 = vadd.f32 %v2280_v54, %v604_v48  ;;  %v714_v35 = vmax.f32 %v650_v55, %v682_v39  ;;  %v687_v43 = vmul.f32 0.2, %v655_v36  ;;  %v659_v44 = vadd.f32 %v2284_v4, %v606_v45 }
 0x157   :  { %873 = vmatprep.mubr.f32.mxu0 %v713_v24  ;;  %978 = vmatprep.mubr.f32.mxu1 %v715_v56  ;;  %v684_v60 = vmul.f32 0.2, %v652_v30  ;;  %v717_v29 = vmax.f32 %v653_v25, %v685_v16  ;;  %v686_v8 = vmul.f32 0.2, %v654_v31  ;;  %v656_v41 = vadd.f32 %v2278_v51, %v603_v46 }
 0x158   :  { %v658_v42 = vadd.f32 %v2282_v49, %v605_v53  ;;  %v719_v63 = vmax.f32 %v655_v36, %v687_v43  ;;  %v689_v0 = vmul.f32 0.2, %v657_v34  ;;  %v691_v27 = vmul.f32 0.2, %v659_v44 }
 0x159   :  { %v661_v47 = vadd.f32 %v2280_v54, %v608_v50  ;;  %v716_v48 = vmax.f32 %v652_v30, %v684_v60  ;;  %v611_v28 = vmul.f32 %v2231_v14, %v2162_v37  ;;  %v613_v45 = vmul.f32 %v2235_v5, %v2164_v38 }
 0x15a   :  { %874 = vmatmul.mubr.f32.gmra.mxu0 %v712_v40  ;;  %979 = vmatmul.mubr.f32.gmra.mxu1 %v714_v35  ;;  %v718_v52 = vmax.f32 %v654_v31, %v686_v8  ;;  %v688_v46 = vmul.f32 0.2, %v656_v41  ;;  %v663_v53 = vadd.f32 %v2284_v4, %v610_v7  ;;  %v660_v17 = vadd.f32 %v2278_v51, %v607_v61 }
 0x15b   :  { %878 = vmatprep.mubr.f32.mxu0 %v717_v29  ;;  %983 = vmatprep.mubr.f32.mxu1 %v719_v63  ;;  %v690_v2 = vmul.f32 0.2, %v658_v42  ;;  %v693_v18 = vmul.f32 0.2, %v661_v47  ;;  %v662_v50 = vadd.f32 %v2282_v49, %v2294_v62  ;;  %v665_v3 = vadd.f32 %v2280_v54, %v612_v1 }
 0x15c   :  { %v721_v55 = vmax.f32 %v657_v34, %v689_v0  ;;  %v723_v37 = vmax.f32 %v659_v44, %v691_v27  ;;  %v695_v6 = vmul.f32 0.2, %v663_v53  ;;  %v667_v38 = vadd.f32 %v2284_v4, %v614_v26 }
 0x15d   :  { %v622_v11 = vmul.f32 %v2237_v15, %v2220_v58  ;;  %v616_v7 = vmul.f32 %v2233_v12, %v2196_v21  ;;  %v618_v61 = vmul.f32 %v2237_v15, %v2198_v22  ;;  %v720_v62 = vmax.f32 %v656_v41, %v688_v46  ;;  %v1105_v46 = vld [vmem:[%s2610_s3 + $0x68] sm:$0xff] }
 0x15e   :  { %879 = vmatmul.mubr.f32.gmra.mxu0 %v716_v48  ;;  %984 = vmatmul.mubr.f32.gmra.mxu1 %v718_v52  ;;  %v692_v1 = vmul.f32 0.2, %v660_v17  ;;  %v664_v13 = vadd.f32 %v2278_v51, %v611_v28  ;;  %v666_v25 = vadd.f32 %v2282_v49, %v613_v45  ;;  %v722_v19 = vmax.f32 %v658_v42, %v690_v2  ;;  %v1107_v45 = vld [vmem:[%s2610_s3 + $0x78] sm:$0xff]  ;;  %v1106_v52 = vld [vmem:[%s2610_s3 + $0x70] sm:$0xff] }
 0x15f   :  { %883 = vmatprep.mubr.f32.mxu0 %v721_v55  ;;  %988 = vmatprep.mubr.f32.mxu1 %v723_v37  ;;  %v725_v59 = vmax.f32 %v661_v47, %v693_v18  ;;  %v694_v23 = vmul.f32 0.2, %v662_v50  ;;  %v697_v58 = vmul.f32 0.2, %v665_v3  ;;  %v727_v20 = vmax.f32 %v663_v53, %v695_v6  ;;  %v1104_v53 = vld [vmem:[%s2610_s3 + $0x60] sm:$0xff]  ;;  %v1102_v2 = vld [vmem:[%s2610_s3 + $0x50] sm:$0xff] }
 0x160   :  { %v699_v32 = vmul.f32 0.2, %v667_v38  ;;  %v669_v24 = vadd.f32 %v2280_v54, %v616_v7  ;;  %v671_v21 = vadd.f32 %v2284_v4, %v618_v61  ;;  %v615_v22 = vmul.f32 %v2231_v14, %v2185_v9  ;;  %1806 = vmatprep.subr.mxu0 %v1107_v45  ;;  %v1101_v18 = vld [vmem:[%s2610_s3 + $0x48] sm:$0xff]  ;;  %v1098_v55 = vld [vmem:[%s2610_s3 + $0x30] sm:$0xff]  ;;  %v1096_v6 = vld [vmem:[%s2610_s3 + $0x20] sm:$0xff] }
 0x161   :  { %v617_v15 = vmul.f32 %v2235_v5, %v2187_v10  ;;  %v620_v39 = vmul.f32 %v2233_v12, %v2218_v57  ;;  %v675_v26 = vadd.f32 %v2284_v4, %v622_v11  ;;  %v724_v56 = vmax.f32 %v660_v17, %v692_v1  ;;  %v2615_v12 = vld [vmem:[#allocation8_spill] sm:$0xff]  ;;  %1807 = vmatpush3.msra.mxu0 %v1107_v45  ;;  %v1103_v17 = vld [vmem:[%s2610_s3 + $0x58] sm:$0xff]  ;;  %v1097_v37 = vld [vmem:[%s2610_s3 + $0x28] sm:$0xff] }
 0x162   :  { %884 = vmatmul.mubr.f32.gmra.mxu0 %v720_v62  ;;  %989 = vmatmul.mubr.f32.gmra.mxu1 %v722_v19  ;;  %v696_v16 = vmul.f32 0.2, %v664_v13  ;;  %v698_v36 = vmul.f32 0.2, %v666_v25  ;;  %v726_v30 = vmax.f32 %v662_v50, %v694_v23  ;;  %v729_v40 = vmax.f32 %v665_v3, %v697_v58  ;;  %v1100_v50 = vld [vmem:[%s2610_s3 + $0x40] sm:$0xff]  ;;  %v1099_v3 = vld [vmem:[%s2610_s3 + $0x38] sm:$0xff] }
 0x163   :  { %888 = vmatprep.mubr.f32.mxu0 %v725_v59  ;;  %993 = vmatprep.mubr.f32.mxu1 %v727_v20  ;;  %v668_v31 = vadd.f32 %v2278_v51, %v615_v22  ;;  %v670_v34 = vadd.f32 %v2282_v49, %v617_v15  ;;  %v731_v9 = vmax.f32 %v667_v38, %v699_v32  ;;  %v701_v35 = vmul.f32 0.2, %v669_v24  ;;  %v1095_v38 = vld [vmem:[%s2610_s3 + $0x18] sm:$0xff]  ;;  %v1094_v11 = vld [vmem:[%s2610_s3 + $0x10] sm:$0xff]  ;;  %v1093_v7 = vld [vmem:[%s2610_s3 + $0x8] sm:$0xff] }
 0x164   :  { %v703_v43 = vmul.f32 0.2, %v671_v21  ;;  %v673_v10 = vadd.f32 %v2280_v54, %v620_v39  ;;  %v619_v57 = vmul.f32 %v2231_v14, %v2207_v33  ;;  %v621_v4 = vmul.f32 %v2235_v5, %v2615_v12  ;;  %1808 = vmatprep.subr.mxu0 %v1106_v52  ;;  %v1092_v61 = vld [vmem:[%s2610_s3] sm:$0xff] }
 0x165   :  { %v728_v60 = vmax.f32 %v664_v13, %v696_v16  ;;  %v730_v44 = vmax.f32 %v666_v25, %v698_v36  ;;  %v700_v29 = vmul.f32 0.2, %v668_v31  ;;  %v702_v8 = vmul.f32 0.2, %v670_v34  ;;  %1809 = vmatpush3.msra.mxu0 %v1106_v52 }
 0x166   :  { %889 = vmatmul.mubr.f32.gmra.mxu0 %v724_v56  ;;  %994 = vmatmul.mubr.f32.gmra.mxu1 %v726_v30  ;;  %v672_v41 = vadd.f32 %v2278_v51, %v619_v57  ;;  %v674_v42 = vadd.f32 %v2282_v49, %v621_v4  ;;  %v733_v63 = vmax.f32 %v669_v24, %v701_v35  ;;  %v705_v0 = vmul.f32 0.2, %v673_v10 }
 0x167   :  { %893 = vmatprep.mubr.f32.mxu0 %v729_v40  ;;  %998 = vmatprep.mubr.f32.mxu1 %v731_v9  ;;  %v735_v54 = vmax.f32 %v671_v21, %v703_v43  ;;  %v707_v27 = vmul.f32 0.2, %v675_v26  ;;  %v732_v33 = vmax.f32 %v668_v31, %v700_v29  ;;  %v734_v14 = vmax.f32 %v670_v34, %v702_v8 }
 0x168   :  { %v704_v5 = vmul.f32 0.2, %v672_v41  ;;  %v706_v47 = vmul.f32 0.2, %v674_v42  ;;  %v737_v48 = vmax.f32 %v673_v10, %v705_v0  ;;  %1810 = vmatprep.subr.mxu0 %v1105_v46 }
 0x169   :  { %v739_v28 = vmax.f32 %v675_v26, %v707_v27  ;;  %1811 = vmatpush3.msra.mxu0 %v1105_v46 }
 0x16a   :  { %894 = vmatmul.mubr.f32.gmra.mxu0 %v728_v60  ;;  %999 = vmatmul.mubr.f32.gmra.mxu1 %v730_v44  ;;  %v736_v51 = vmax.f32 %v672_v41, %v704_v5  ;;  %v738_v49 = vmax.f32 %v674_v42, %v706_v47 }
 0x16b   :  { %898 = vmatprep.mubr.f32.mxu0 %v733_v63  ;;  %1003 = vmatprep.mubr.f32.mxu1 %v735_v54 }
 0x16c   :  { %1812 = vmatprep.subr.mxu0 %v1104_v53 }
 0x16d   :  { %1813 = vmatpush3.msra.mxu0 %v1104_v53 }
 0x16e   :  { %899 = vmatmul.mubr.f32.gmra.mxu0 %v732_v33  ;;  %1004 = vmatmul.mubr.f32.gmra.mxu1 %v734_v14 }
 0x16f   :  { %903 = vmatprep.mubr.f32.mxu0 %v737_v48  ;;  %1008 = vmatprep.mubr.f32.mxu1 %v739_v28 }
 0x170   :  { %1814 = vmatprep.subr.mxu0 %v1103_v17 }
 0x171   :  { %1815 = vmatpush3.msra.mxu0 %v1103_v17 }
 0x172   :  { %904 = vmatmul.mubr.f32.gmra.mxu0 %v736_v51  ;;  %1009 = vmatmul.mubr.f32.gmra.mxu1 %v738_v49 }
 0x173   :  { %1816 = vmatprep.subr.mxu0 %v1102_v2 }
 0x174   :  { %1817 = vmatpush3.msra.mxu0 %v1102_v2 }
 0x175   :  { %1818 = vmatprep.subr.mxu0 %v1101_v18 }
 0x176   :  { %1819 = vmatpush3.msra.mxu0 %v1101_v18 }
 0x177   :  { %1820 = vmatprep.subr.mxu0 %v1100_v50 }
 0x178   :  { %1821 = vmatpush3.msra.mxu0 %v1100_v50 }
 0x179   :  { %1822 = vmatprep.subr.mxu0 %v1099_v3 }
 0x17a   :  { %1823 = vmatpush3.msra.mxu0 %v1099_v3 }
 0x17b   :  { %1824 = vmatprep.subr.mxu0 %v1098_v55 }
 0x17c   :  { %1825 = vmatpush3.msra.mxu0 %v1098_v55 }
 0x17d   :  { %1826 = vmatprep.subr.mxu0 %v1097_v37 }
 0x17e   :  { %1827 = vmatpush3.msra.mxu0 %v1097_v37 }
 0x17f   :  { %1828 = vmatprep.subr.mxu0 %v1096_v6 }
 0x180   :  { %1829 = vmatpush3.msra.mxu0 %v1096_v6 }
 0x181   :  { %1830 = vmatprep.subr.mxu0 %v1095_v38 }
 0x182   :  { %1831 = vmatpush3.msra.mxu0 %v1095_v38 }
 0x183   :  { %1832 = vmatprep.subr.mxu0 %v1094_v11 }
 0x184   :  { %1833 = vmatpush3.msra.mxu0 %v1094_v11 }
 0x185   :  { %1834 = vmatprep.subr.mxu0 %v1093_v7 }
 0x186   :  { %1835 = vmatpush3.msra.mxu0 %v1093_v7 }
 0x187   :  { %1836 = vmatprep.subr.mxu0 %v1092_v61 }
 0x188   :  { %1837 = vmatpush3.msra.mxu0 %v1092_v61 }
 0x216   :  { %v1690_v62 = vpop.f32.mrf.mxu0  ;;  %v1746_v1 = vpop.f32.mrf.mxu1 }
 0x218   :  { %v1691_v13 = vpop.f32.mrf.mxu0  ;;  %v1747_v25 = vpop.f32.mrf.mxu1 }
 0x219   :  { %v1692_v56 = vadd.f32 %v1691_v13, %v1690_v62  ;;  %v1748_v16 = vadd.f32 %v1747_v25, %v1746_v1 }
 0x21a   :  { %v1693_v19 = vpop.f32.mrf.mxu0  ;;  %v1749_v59 = vpop.f32.mrf.mxu1 }
 0x21b   :  { %v2403_v57 = vadd.f32 %v1748_v16, %v1692_v56 }
 0x21c   :  { %v1694_v23 = vpop.f32.mrf.mxu0  ;;  %v1750_v58 = vpop.f32.mrf.mxu1 }
 0x21d   :  { %v1695_v22 = vadd.f32 %v1694_v23, %v1693_v19  ;;  %v1751_v15 = vadd.f32 %v1750_v58, %v1749_v59  ;;  %v1029_v54 = vmul.f32 %v2403_v57, %v2403_v57 }
 0x21e   :  { %v1696_v20 = vpop.f32.mrf.mxu0  ;;  %v1752_v32 = vpop.f32.mrf.mxu1 }
 0x21f   :  { %v2401_v34 = vadd.f32 %v1751_v15, %v1695_v22 }
 0x220   :  { %v1697_v24 = vpop.f32.mrf.mxu0  ;;  %v1753_v21 = vpop.f32.mrf.mxu1 }
 0x221   :  { %v1698_v36 = vadd.f32 %v1697_v24, %v1696_v20  ;;  %v1754_v30 = vadd.f32 %v1753_v21, %v1752_v32  ;;  %v1030_v8 = vmul.f32 %v2401_v34, %v2401_v34  ;;  %v1016_v5 = vadd.f32 %v2401_v34, %v2403_v57 }
 0x222   :  { %v1699_v39 = vpop.f32.mrf.mxu0  ;;  %v1755_v26 = vpop.f32.mrf.mxu1 }
 0x223   :  { %v2405_v12 = vadd.f32 %v1754_v30, %v1698_v36  ;;  %v1037_v28 = vadd.f32 %v1030_v8, %v1029_v54 }
 0x224   :  { %v1700_v40 = vpop.f32.mrf.mxu0  ;;  %v1756_v31 = vpop.f32.mrf.mxu1 }
 0x225   :  { %v1701_v9 = vadd.f32 %v1700_v40, %v1699_v39  ;;  %v1757_v35 = vadd.f32 %v1756_v31, %v1755_v26  ;;  %v1031_v0 = vmul.f32 %v2405_v12, %v2405_v12  ;;  %v1017_v52 = vadd.f32 %v1016_v5, %v2405_v12 }
 0x226   :  { %v1702_v43 = vpop.f32.mrf.mxu0  ;;  %v1758_v10 = vpop.f32.mrf.mxu1 }
 0x227   :  { %v2409_v41 = vadd.f32 %v1757_v35, %v1701_v9  ;;  %v1038_v53 = vadd.f32 %v1037_v28, %v1031_v0 }
 0x228   :  { %v1703_v4 = vpop.f32.mrf.mxu0  ;;  %v1759_v60 = vpop.f32.mrf.mxu1 }
 0x229   :  { %v1704_v44 = vadd.f32 %v1703_v4, %v1702_v43  ;;  %v1760_v29 = vadd.f32 %v1759_v60, %v1758_v10  ;;  %v1032_v51 = vmul.f32 %v2409_v41, %v2409_v41  ;;  %v1018_v50 = vadd.f32 %v1017_v52, %v2409_v41 }
 0x22a   :  { %v1705_v42 = vpop.f32.mrf.mxu0  ;;  %v1761_v63 = vpop.f32.mrf.mxu1 }
 0x22b   :  { %v2415_v27 = vadd.f32 %v1760_v29, %v1704_v44  ;;  %v1039_v37 = vadd.f32 %v1038_v53, %v1032_v51 }
 0x22c   :  { %v1706_v33 = vpop.f32.mrf.mxu0  ;;  %v1762_v14 = vpop.f32.mrf.mxu1 }
 0x22d   :  { %v1707_v47 = vadd.f32 %v1706_v33, %v1705_v42  ;;  %v1763_v48 = vadd.f32 %v1762_v14, %v1761_v63  ;;  %v1033_v17 = vmul.f32 %v2415_v27, %v2415_v27  ;;  %v1019_v11 = vadd.f32 %v1018_v50, %v2415_v27  ;;  %v1014_v63 = vld [vmem:[%s2611_s4 + $0x2] ss:$0 sm:$0xff]  ;;  %v1015_v33 = vld [vmem:[%s2611_s4 + $0x3] ss:$0 sm:$0xff] }
 0x22e   :  { %v1708_v49 = vpop.f32.mrf.mxu0  ;;  %v1764_v45 = vpop.f32.mrf.mxu1 }
 0x22f   :  { %v2422_v46 = vadd.f32 %v1763_v48, %v1707_v47  ;;  %v1040_v62 = vadd.f32 %v1039_v37, %v1033_v17 }
 0x230   :  { %v1709_v2 = vpop.f32.mrf.mxu0  ;;  %v1765_v18 = vpop.f32.mrf.mxu1 }
 0x231   :  { %v1710_v3 = vadd.f32 %v1709_v2, %v1708_v49  ;;  %v1766_v55 = vadd.f32 %v1765_v18, %v1764_v45  ;;  %v1034_v7 = vmul.f32 %v2422_v46, %v2422_v46  ;;  %v1020_v25 = vadd.f32 %v1019_v11, %v2422_v46 }
 0x232   :  { %v1711_v6 = vpop.f32.mrf.mxu0  ;;  %v1767_v38 = vpop.f32.mrf.mxu1 }
 0x233   :  { %v1006_v61 = vadd.f32 %v1766_v55, %v1710_v3  ;;  %v1041_v58 = vadd.f32 %v1040_v62, %v1034_v7 }
 0x234   :  { %v1712_v1 = vpop.f32.mrf.mxu0  ;;  %v1768_v13 = vpop.f32.mrf.mxu1 }
 0x235   :  { %v1035_v19 = vmul.f32 %v1006_v61, %v1006_v61  ;;  %v1713_v59 = vadd.f32 %v1712_v1, %v1711_v6  ;;  %v1769_v23 = vadd.f32 %v1768_v13, %v1767_v38  ;;  %v1021_v20 = vadd.f32 %v1020_v25, %v1006_v61 }
 0x237   :  { %v1011_v32 = vadd.f32 %v1769_v23, %v1713_v59  ;;  %v1042_v24 = vadd.f32 %v1041_v58, %v1035_v19  ;;  %v1311_v23 = vld [vmem:[%s2610_s3 + $0x98] sm:$0xff]  ;;  %v1310_v58 = vld [vmem:[%s2610_s3 + $0x90] sm:$0xff] }
 0x238   :  { %1850 = vmatprep.subr.mxu1 %v1311_v23 }
 0x239   :  { %v1022_v21 = vadd.f32 %v1021_v20, %v1011_v32  ;;  %v1036_v22 = vmul.f32 %v1011_v32, %v1011_v32  ;;  %1851 = vmatpush3.msra.mxu1 %v1311_v23  ;;  %v1309_v20 = vld [vmem:[%s2610_s3 + $0x88] sm:$0xff] }
 0x23a   :  { %1852 = vmatprep.subr.mxu1 %v1310_v58 }
 0x23b   :  { %v1023_v15 = vrot.slane %v1022_v21, 4  ;;  %v1043_v39 = vadd.f32 %v1042_v24, %v1036_v22  ;;  %1853 = vmatpush3.msra.mxu1 %v1310_v58 }
 0x23c   :  { %1854 = vmatprep.subr.mxu1 %v1309_v20 }
 0x23d   :  { %v1024_v26 = vadd.f32 %v1023_v15, %v1022_v21  ;;  %v1044_v56 = vrot.slane %v1043_v39, 4  ;;  %1855 = vmatpush3.msra.mxu1 %v1309_v20 }
 0x23f   :  { %v1025_v16 = vrot.slane %v1024_v26, 2  ;;  %v1045_v36 = vadd.f32 %v1044_v56, %v1043_v39 }
 0x241   :  { %v1026_v30 = vadd.f32 %v1025_v16, %v1024_v26  ;;  %v1046_v40 = vrot.slane %v1045_v36, 2 }
 0x243   :  { %v1027_v31 = vrot.slane %v1026_v30, 1  ;;  %v1047_v9 = vadd.f32 %v1046_v40, %v1045_v36 }
 0x245   :  { %v1028_v35 = vadd.f32 %v1027_v31, %v1026_v30  ;;  %v1048_v43 = vrot.slane %v1047_v9, 1 }
 0x247   :  { %v1049_v10 = vadd.f32 %v1048_v43, %v1047_v9  ;;  %v1050_v4 = vmul.f32 0.015625, %v1028_v35 }
 0x249   :  { %v1051_v60 = vmul.f32 0.015625, %v1049_v10  ;;  %v1052_v44 = vmul.f32 %v1050_v4, %v1050_v4 }
 0x24b   :  { %v1053_v29 = vsub.f32 %v1051_v60, %v1052_v44 }
 0x24d   :  { %v1054_v8 = vmax.f32 %v1053_v29, 0.0 }
 0x24f   :  { %v1055_v42 = vadd.f32 1e-05, %v1054_v8 }
 0x251   :  { %1886 = vrsqrt.f32 %v1055_v42 }
 0x25e   :  { %v1887_v54 = vpop.eup %1886 }
 0x25f   :  { %v1057_v0 = vmul.f32 %v1887_v54, %v1014_v63 }
 0x261   :  { %v1058_v14 = vmul.f32 %v1057_v0, %v1050_v4  ;;  %v1060_v47 = vmul.f32 %v1057_v0, %v2403_v57  ;;  %v1061_v48 = vmul.f32 %v1057_v0, %v2401_v34  ;;  %v1062_v28 = vmul.f32 %v1057_v0, %v2405_v12 }
 0x262   :  { %v1063_v51 = vmul.f32 %v1057_v0, %v2409_v41  ;;  %v1064_v53 = vmul.f32 %v1057_v0, %v2415_v27  ;;  %v1065_v55 = vmul.f32 %v1057_v0, %v2422_v46  ;;  %v1066_v6 = vmul.f32 %v1057_v0, %v1006_v61 }
 0x263   :  { %v1059_v5 = vsub.f32 %v1015_v33, %v1058_v14  ;;  %v1067_v7 = vmul.f32 %v1057_v0, %v1011_v32  ;;  %v1308_v32 = vld [vmem:[%s2610_s3 + $0x80] sm:$0xff] }
 0x264   :  { %1856 = vmatprep.subr.mxu1 %v1308_v32 }
 0x265   :  { %v1068_v49 = vadd.f32 %v1060_v47, %v1059_v5  ;;  %v1069_v45 = vadd.f32 %v1061_v48, %v1059_v5  ;;  %v1070_v52 = vadd.f32 %v1062_v28, %v1059_v5  ;;  %v1071_v17 = vadd.f32 %v1063_v51, %v1059_v5  ;;  %1857 = vmatpush3.msra.mxu1 %v1308_v32 }
 0x266   :  { %v1072_v3 = vadd.f32 %v1064_v53, %v1059_v5  ;;  %v1073_v38 = vadd.f32 %v1065_v55, %v1059_v5  ;;  %v1074_v11 = vadd.f32 %v1066_v6, %v1059_v5  ;;  %v1075_v1 = vadd.f32 %v1067_v7, %v1059_v5 }
 0x267   :  { %v1076_v2 = vmul.f32 0.2, %v1068_v49  ;;  %v1077_v18 = vmul.f32 0.2, %v1069_v45  ;;  %v1078_v50 = vmul.f32 0.2, %v1070_v52 }
 0x268   :  { %v1079_v34 = vmul.f32 0.2, %v1071_v17  ;;  %v1080_v41 = vmul.f32 0.2, %v1072_v3  ;;  %v1081_v62 = vmul.f32 0.2, %v1073_v38 }
 0x269   :  { %v1084_v37 = vmax.f32 %v1068_v49, %v1076_v2  ;;  %v1085_v57 = vmax.f32 %v1069_v45, %v1077_v18  ;;  %v1086_v12 = vmax.f32 %v1070_v52, %v1078_v50  ;;  %v1082_v25 = vmul.f32 0.2, %v1074_v11 }
 0x26a   :  { %v1087_v27 = vmax.f32 %v1071_v17, %v1079_v34  ;;  %v1088_v13 = vmax.f32 %v1072_v3, %v1080_v41  ;;  %v1089_v46 = vmax.f32 %v1073_v38, %v1081_v62  ;;  %v1083_v19 = vmul.f32 0.2, %v1075_v1 }
 0x26b   :  { %1838 = vmatprep.mubr.f32.mxu0 %v1084_v37  ;;  %v1090_v59 = vmax.f32 %v1074_v11, %v1082_v25 }
 0x26c   :  { %1839 = vmatmul.mubr.f32.vlgmr.msra.gmra.mxu0 %v1085_v57  ;;  %v1091_v61 = vmax.f32 %v1075_v1, %v1083_v19 }
 0x26d   :  { %1841 = vmatprep.mubr.f32.mxu0 %v1086_v12 }
 0x270   :  { %1842 = vmatmul.mubr.f32.gmra.mxu0 %v1087_v27 }
 0x271   :  { %1844 = vmatprep.mubr.f32.mxu0 %v1088_v13 }
 0x274   :  { %1845 = vmatmul.mubr.f32.gmra.mxu0 %v1089_v46 }
 0x275   :  { %1847 = vmatprep.mubr.f32.mxu0 %v1090_v59 }
 0x278   :  { %1848 = vmatmul.mubr.f32.gmra.mxu0 %v1091_v61 }
 0x32c   :  { %v2455_v24 = vpop.f32.mrf.mxu0 }
 0x32d   :  { %v1238_v22 = vmul.f32 %v2455_v24, %v2455_v24  ;;  %v1217_v56 = vsel %vm1215_vm1, %v2455_v24, 0.0 }
 0x32e   :  { %v2457_v21 = vpop.f32.mrf.mxu0 }
 0x32f   :  { %v1216_v15 = vsel %vm1215_vm1, %v2457_v21, 0.0  ;;  %v1237_v39 = vmul.f32 %v2457_v21, %v2457_v21  ;;  %v1246_v40 = vsel %vm1215_vm1, %v1238_v22, 0.0  ;;  %v1213_v22 = vld [vmem:[%s2611_s4 + $0x4] ss:$0 sm:$0xff] }
 0x330   :  { %v2465_v26 = vpop.f32.mrf.mxu0  ;;  %v1218_v36 = vadd.f32 %v1217_v56, %v1216_v15  ;;  %v1214_v56 = vld [vmem:[%s2611_s4 + $0x5] ss:$0 sm:$0xff] }
 0x331   :  { %v1245_v16 = vsel %vm1215_vm1, %v1237_v39, 0.0  ;;  %v1240_v31 = vmul.f32 %v2465_v26, %v2465_v26  ;;  %v1221_v60 = vsel %vm1215_vm1, %v2465_v26, 0.0 }
 0x332   :  { %v2470_v30 = vpop.f32.mrf.mxu0  ;;  %v1247_v43 = vadd.f32 %v1246_v40, %v1245_v16 }
 0x333   :  { %v1219_v9 = vsel %vm1215_vm1, %v2470_v30, 0.0  ;;  %v1239_v35 = vmul.f32 %v2470_v30, %v2470_v30  ;;  %v1250_v63 = vsel %vm1215_vm1, %v1240_v31, 0.0 }
 0x334   :  { %v1220_v10 = vadd.f32 %v1219_v9, %v1218_v36  ;;  %v2479_v4 = vpop.f32.mrf.mxu0 }
 0x335   :  { %v1248_v44 = vsel %vm1215_vm1, %v1239_v35, 0.0  ;;  %v1242_v54 = vmul.f32 %v2479_v4, %v2479_v4  ;;  %v1225_v48 = vsel %vm1215_vm1, %v2479_v4, 0.0 }
 0x336   :  { %v1249_v29 = vadd.f32 %v1248_v44, %v1247_v43  ;;  %v1194_v8 = vpop.f32.mrf.mxu0  ;;  %v1222_v42 = vadd.f32 %v1221_v60, %v1220_v10 }
 0x337   :  { %v1223_v0 = vsel %vm1215_vm1, %v1194_v8, 0.0  ;;  %v1241_v33 = vmul.f32 %v1194_v8, %v1194_v8  ;;  %v1254_v52 = vsel %vm1215_vm1, %v1242_v54, 0.0 }
 0x338   :  { %v1224_v14 = vadd.f32 %v1223_v0, %v1222_v42  ;;  %v1251_v5 = vadd.f32 %v1250_v63, %v1249_v29  ;;  %v2488_v47 = vpop.f32.mrf.mxu0 }
 0x339   :  { %v1252_v28 = vsel %vm1215_vm1, %v1241_v33, 0.0  ;;  %v1244_v53 = vmul.f32 %v2488_v47, %v2488_v47  ;;  %v1229_v3 = vsel %vm1215_vm1, %v2488_v47, 0.0 }
 0x33a   :  { %v1253_v51 = vadd.f32 %v1252_v28, %v1251_v5  ;;  %v1204_v49 = vpop.f32.mrf.mxu0  ;;  %v1226_v45 = vadd.f32 %v1225_v48, %v1224_v14 }
 0x33b   :  { %v1227_v17 = vsel %vm1215_vm1, %v1204_v49, 0.0  ;;  %v1243_v2 = vmul.f32 %v1204_v49, %v1204_v49  ;;  %v1258_v6 = vsel %vm1215_vm1, %v1244_v53, 0.0 }
 0x33c   :  { %v1228_v18 = vadd.f32 %v1227_v17, %v1226_v45  ;;  %v1255_v50 = vadd.f32 %v1254_v52, %v1253_v51 }
 0x33d   :  { %v1256_v55 = vsel %vm1215_vm1, %v1243_v2, 0.0 }
 0x33e   :  { %v1230_v37 = vadd.f32 %v1229_v3, %v1228_v18  ;;  %v1257_v57 = vadd.f32 %v1256_v55, %v1255_v50 }
 0x340   :  { %v1231_v34 = vrot.slane %v1230_v37, 4  ;;  %v1259_v38 = vadd.f32 %v1258_v6, %v1257_v57 }
 0x342   :  { %v1232_v12 = vadd.f32 %v1231_v34, %v1230_v37  ;;  %v1260_v41 = vrot.slane %v1259_v38, 4 }
 0x344   :  { %v1233_v11 = vrot.slane %v1232_v12, 2  ;;  %v1261_v7 = vadd.f32 %v1260_v41, %v1259_v38 }
 0x346   :  { %v1234_v27 = vadd.f32 %v1233_v11, %v1232_v12  ;;  %v1262_v62 = vrot.slane %v1261_v7, 2 }
 0x348   :  { %v1235_v1 = vrot.slane %v1234_v27, 1  ;;  %v1263_v13 = vadd.f32 %v1262_v62, %v1261_v7 }
 0x34a   :  { %v1236_v25 = vadd.f32 %v1235_v1, %v1234_v27  ;;  %v1264_v46 = vrot.slane %v1263_v13, 1 }
 0x34c   :  { %v1265_v19 = vadd.f32 %v1264_v46, %v1263_v13  ;;  %v1266_v59 = vmul.f32 0.015625, %v1236_v25 }
 0x34e   :  { %v1267_v61 = vmul.f32 0.015625, %v1265_v19  ;;  %v1268_v23 = vmul.f32 %v1266_v59, %v1266_v59 }
 0x350   :  { %v1269_v58 = vsub.f32 %v1267_v61, %v1268_v23 }
 0x352   :  { %v1270_v20 = vmax.f32 %v1269_v58, 0.0 }
 0x354   :  { %v1271_v32 = vadd.f32 1e-05, %v1270_v20 }
 0x356   :  { %1888 = vrsqrt.f32 %v1271_v32 }
 0x363   :  { %v1889_v15 = vpop.eup %1888 }
 0x364   :  { %v1273_v39 = vmul.f32 %v1889_v15, %v1213_v22 }
 0x366   :  { %v1274_v16 = vmul.f32 %v1273_v39, %v1266_v59  ;;  %v1276_v40 = vmul.f32 %v1273_v39, %v2457_v21  ;;  %v1277_v31 = vmul.f32 %v2455_v24, %v1273_v39  ;;  %v1278_v9 = vmul.f32 %v1273_v39, %v2470_v30 }
 0x367   :  { %v1279_v35 = vmul.f32 %v2465_v26, %v1273_v39  ;;  %v1280_v44 = vmul.f32 %v1273_v39, %v1194_v8  ;;  %v1281_v33 = vmul.f32 %v2479_v4, %v1273_v39  ;;  %v1282_v14 = vmul.f32 %v1273_v39, %v1204_v49 }
 0x368   :  { %v1275_v36 = vsub.f32 %v1214_v56, %v1274_v16  ;;  %v1283_v8 = vmul.f32 %v2488_v47, %v1273_v39 }
 0x36a   :  { %v1284_v43 = vadd.f32 %v1276_v40, %v1275_v36  ;;  %v1285_v10 = vadd.f32 %v1277_v31, %v1275_v36  ;;  %v1286_v60 = vadd.f32 %v1278_v9, %v1275_v36  ;;  %v1287_v29 = vadd.f32 %v1279_v35, %v1275_v36 }
 0x36b   :  { %v1288_v54 = vadd.f32 %v1280_v44, %v1275_v36  ;;  %v1289_v24 = vadd.f32 %v1281_v33, %v1275_v36  ;;  %v1290_v28 = vadd.f32 %v1282_v14, %v1275_v36  ;;  %v1291_v52 = vadd.f32 %v1283_v8, %v1275_v36 }
 0x36c   :  { %v1292_v42 = vmul.f32 0.2, %v1284_v43  ;;  %v1293_v63 = vmul.f32 0.2, %v1285_v10  ;;  %v1294_v0 = vmul.f32 0.2, %v1286_v60 }
 0x36d   :  { %v1295_v48 = vmul.f32 0.2, %v1287_v29  ;;  %v1296_v30 = vmul.f32 0.2, %v1288_v54  ;;  %v1297_v45 = vmul.f32 0.2, %v1289_v24 }
 0x36e   :  { %v1300_v5 = vmax.f32 %v1284_v43, %v1292_v42  ;;  %v1301_v21 = vmax.f32 %v1285_v10, %v1293_v63  ;;  %v1302_v26 = vmax.f32 %v1286_v60, %v1294_v0  ;;  %v1298_v4 = vmul.f32 0.2, %v1290_v28 }
 0x36f   :  { %v1303_v51 = vmax.f32 %v1287_v29, %v1295_v48  ;;  %v1304_v49 = vmax.f32 %v1288_v54, %v1296_v30  ;;  %v1305_v53 = vmax.f32 %v1289_v24, %v1297_v45  ;;  %v1299_v17 = vmul.f32 0.2, %v1291_v52 }
 0x370   :  { %1858 = vmatprep.mubr.msk.f32.mxu1 %vm1215_vm1, %v1300_v5  ;;  %v1306_v2 = vmax.f32 %v1290_v28, %v1298_v4 }
 0x371   :  { %1859 = vmatmul.mubr.msk.f32.vlgmr.msra.gmra.mxu1 %vm1215_vm1, %v1301_v21  ;;  %v1307_v18 = vmax.f32 %v1291_v52, %v1299_v17 }
 0x372   :  { %1861 = vmatprep.mubr.msk.f32.mxu1 %vm1215_vm1, %v1302_v26 }
 0x375   :  { %1862 = vmatmul.mubr.msk.f32.gmra.mxu1 %vm1215_vm1, %v1303_v51 }
 0x376   :  { %1864 = vmatprep.mubr.msk.f32.mxu1 %vm1215_vm1, %v1304_v49 }
 0x379   :  { %1865 = vmatmul.mubr.msk.f32.gmra.mxu1 %vm1215_vm1, %v1305_v53 }
 0x37a   :  { %1867 = vmatprep.mubr.msk.f32.mxu1 %vm1215_vm1, %v1306_v2 }
 0x37d   :  { %1868 = vmatmul.mubr.msk.f32.gmra.mxu1 %vm1215_vm1, %v1307_v18 }
 0x431   :  { %v2521_v47 = vpop.f32.mrf.mxu1 }
 0x432   :  { %v1466_v3 = vmul.f32 %v2521_v47, %v2521_v47  ;;  %v1445_v6 = vsel %vm1443_vm2, %v2521_v47, 0.0 }
 0x433   :  { %v2523_v50 = vpop.f32.mrf.mxu1 }
 0x434   :  { %v1444_v55 = vsel %vm1443_vm2, %v2523_v50, 0.0  ;;  %v1465_v37 = vmul.f32 %v2523_v50, %v2523_v50  ;;  %v1474_v41 = vsel %vm1443_vm2, %v1466_v3, 0.0  ;;  %v1441_v3 = vld [vmem:[%s2611_s4 + $0x6] ss:$0 sm:$0xff] }
 0x435   :  { %v2531_v57 = vpop.f32.mrf.mxu1  ;;  %v1446_v38 = vadd.f32 %v1445_v6, %v1444_v55  ;;  %v1442_v6 = vld [vmem:[%s2611_s4 + $0x7] ss:$0 sm:$0xff] }
 0x436   :  { %v1473_v34 = vsel %vm1443_vm2, %v1465_v37, 0.0  ;;  %v1468_v11 = vmul.f32 %v2531_v57, %v2531_v57  ;;  %v1449_v25 = vsel %vm1443_vm2, %v2531_v57, 0.0 }
 0x437   :  { %v1412_v12 = vpop.f32.mrf.mxu1  ;;  %v1475_v62 = vadd.f32 %v1474_v41, %v1473_v34 }
 0x438   :  { %v1447_v7 = vsel %vm1443_vm2, %v1412_v12, 0.0  ;;  %v1467_v27 = vmul.f32 %v1412_v12, %v1412_v12  ;;  %v1478_v23 = vsel %vm1443_vm2, %v1468_v11, 0.0 }
 0x439   :  { %v1448_v1 = vadd.f32 %v1447_v7, %v1446_v38  ;;  %v1866_v13 = vpop.f32.mrf.mxu1 }
 0x43a   :  { %v1476_v46 = vsel %vm1443_vm2, %v1467_v27, 0.0  ;;  %v1470_v58 = vmul.f32 %v1866_v13, %v1866_v13  ;;  %v1453_v56 = vsel %vm1443_vm2, %v1866_v13, 0.0 }
 0x43b   :  { %v1477_v19 = vadd.f32 %v1476_v46, %v1475_v62  ;;  %v1422_v59 = vpop.f32.mrf.mxu1  ;;  %v1450_v61 = vadd.f32 %v1449_v25, %v1448_v1 }
 0x43c   :  { %v1451_v20 = vsel %vm1443_vm2, %v1422_v59, 0.0  ;;  %v1469_v32 = vmul.f32 %v1422_v59, %v1422_v59  ;;  %v1482_v9 = vsel %vm1443_vm2, %v1470_v58, 0.0 }
 0x43d   :  { %v1452_v22 = vadd.f32 %v1451_v20, %v1450_v61  ;;  %v1479_v15 = vadd.f32 %v1478_v23, %v1477_v19  ;;  %v1869_v39 = vpop.f32.mrf.mxu1 }
 0x43e   :  { %v1480_v16 = vsel %vm1443_vm2, %v1469_v32, 0.0  ;;  %v1472_v35 = vmul.f32 %v1869_v39, %v1869_v39  ;;  %v1457_v29 = vsel %vm1443_vm2, %v1869_v39, 0.0 }
 0x43f   :  { %v1481_v36 = vadd.f32 %v1480_v16, %v1479_v15  ;;  %v1432_v40 = vpop.f32.mrf.mxu1  ;;  %v1454_v31 = vadd.f32 %v1453_v56, %v1452_v22 }
 0x440   :  { %v1455_v43 = vsel %vm1443_vm2, %v1432_v40, 0.0  ;;  %v1471_v10 = vmul.f32 %v1432_v40, %v1432_v40  ;;  %v1486_v0 = vsel %vm1443_vm2, %v1472_v35, 0.0 }
 0x441   :  { %v1456_v60 = vadd.f32 %v1455_v43, %v1454_v31  ;;  %v1483_v44 = vadd.f32 %v1482_v9, %v1481_v36 }
 0x442   :  { %v1484_v42 = vsel %vm1443_vm2, %v1471_v10, 0.0 }
 0x443   :  { %v1458_v63 = vadd.f32 %v1457_v29, %v1456_v60  ;;  %v1485_v54 = vadd.f32 %v1484_v42, %v1483_v44 }
 0x445   :  { %v1459_v33 = vrot.slane %v1458_v63, 4  ;;  %v1487_v14 = vadd.f32 %v1486_v0, %v1485_v54 }
 0x447   :  { %v1460_v5 = vadd.f32 %v1459_v33, %v1458_v63  ;;  %v1488_v21 = vrot.slane %v1487_v14, 4 }
 0x449   :  { %v1461_v48 = vrot.slane %v1460_v5, 2  ;;  %v1489_v24 = vadd.f32 %v1488_v21, %v1487_v14 }
 0x44b   :  { %v1462_v28 = vadd.f32 %v1461_v48, %v1460_v5  ;;  %v1490_v26 = vrot.slane %v1489_v24, 2 }
 0x44d   :  { %v1463_v30 = vrot.slane %v1462_v28, 1  ;;  %v1491_v8 = vadd.f32 %v1490_v26, %v1489_v24 }
 0x44f   :  { %v1464_v51 = vadd.f32 %v1463_v30, %v1462_v28  ;;  %v1492_v45 = vrot.slane %v1491_v8, 1 }
 0x451   :  { %v1493_v52 = vadd.f32 %v1492_v45, %v1491_v8  ;;  %v1494_v4 = vmul.f32 0.015625, %v1464_v51  ;;  %v1537_v51 = vld [vmem:[%s2611_s4 + $0x21] ss:$0 sm:$0xff] }
 0x453   :  { %v1495_v49 = vmul.f32 0.015625, %v1493_v52  ;;  %v1496_v53 = vmul.f32 %v1494_v4, %v1494_v4 }
 0x455   :  { %v1497_v17 = vsub.f32 %v1495_v49, %v1496_v53 }
 0x457   :  { %v1498_v2 = vmax.f32 %v1497_v17, 0.0 }
 0x459   :  { %v1499_v18 = vadd.f32 1e-05, %v1498_v2 }
 0x45b   :  { %1890 = vrsqrt.f32 %v1499_v18 }
 0x468   :  { %v1891_v55 = vpop.eup %1890 }
 0x469   :  { %v1501_v37 = vmul.f32 %v1891_v55, %v1441_v3 }
 0x46b   :  { %v1502_v34 = vmul.f32 %v1501_v37, %v1494_v4  ;;  %v1506_v41 = vmul.f32 %v1501_v37, %v1412_v12  ;;  %v1504_v11 = vmul.f32 %v1501_v37, %v2523_v50  ;;  %v1507_v7 = vmul.f32 %v2531_v57, %v1501_v37  ;;  %v1536_v50 = vld [vmem:[%s2611_s4 + $0x20] ss:$0 sm:$0xff] }
 0x46c   :  { %v1505_v27 = vmul.f32 %v2521_v47, %v1501_v37  ;;  %v1509_v62 = vmul.f32 %v1866_v13, %v1501_v37  ;;  %v1508_v1 = vmul.f32 %v1501_v37, %v1422_v59  ;;  %v1510_v25 = vmul.f32 %v1501_v37, %v1432_v40 }
 0x46d   :  { %v1503_v38 = vsub.f32 %v1442_v6, %v1502_v34  ;;  %v1511_v32 = vmul.f32 %v1869_v39, %v1501_v37 }
 0x46f   :  { %v1514_v46 = vadd.f32 %v1506_v41, %v1503_v38  ;;  %v1512_v19 = vadd.f32 %v1504_v11, %v1503_v38  ;;  %v1515_v61 = vadd.f32 %v1507_v7, %v1503_v38  ;;  %v1513_v23 = vadd.f32 %v1505_v27, %v1503_v38 }
 0x470   :  { %v1517_v58 = vadd.f32 %v1509_v62, %v1503_v38  ;;  %v1516_v20 = vadd.f32 %v1508_v1, %v1503_v38  ;;  %v1518_v22 = vadd.f32 %v1510_v25, %v1503_v38  ;;  %v1519_v13 = vadd.f32 %v1511_v32, %v1503_v38 }
 0x471   :  { %v1522_v15 = vmul.f32 0.2, %v1514_v46  ;;  %v1520_v12 = vmul.f32 0.2, %v1512_v19  ;;  %v1523_v57 = vmul.f32 0.2, %v1515_v61 }
 0x472   :  { %v1521_v56 = vmul.f32 0.2, %v1513_v23  ;;  %v1525_v47 = vmul.f32 0.2, %v1517_v58  ;;  %v1524_v36 = vmul.f32 0.2, %v1516_v20 }
 0x473   :  { %v1530_v59 = vmax.f32 %v1514_v46, %v1522_v15  ;;  %v1528_v16 = vmax.f32 %v1512_v19, %v1520_v12  ;;  %v1531_v40 = vmax.f32 %v1515_v61, %v1523_v57  ;;  %v1526_v43 = vmul.f32 0.2, %v1518_v22 }
 0x474   :  { %v1529_v31 = vmax.f32 %v1513_v23, %v1521_v56  ;;  %v1533_v39 = vmax.f32 %v1517_v58, %v1525_v47  ;;  %v1532_v10 = vmax.f32 %v1516_v20, %v1524_v36  ;;  %v1527_v60 = vmul.f32 0.2, %v1519_v13 }
 0x475   :  { %v1540_v9 = vmul.f32 %v1536_v50, %v1530_v59  ;;  %v1538_v35 = vmul.f32 %v1536_v50, %v1528_v16  ;;  %v1541_v42 = vmul.f32 %v1536_v50, %v1531_v40  ;;  %v1534_v0 = vmax.f32 %v1518_v22, %v1526_v43 }
 0x476   :  { %v1539_v63 = vmul.f32 %v1536_v50, %v1529_v31  ;;  %v1535_v54 = vmax.f32 %v1519_v13, %v1527_v60  ;;  %v1543_v5 = vmul.f32 %v1536_v50, %v1533_v39  ;;  %v1542_v21 = vmul.f32 %v1536_v50, %v1532_v10 }
 0x477   :  { %v1552_v44 = vsel %vm1443_vm2, %v1540_v9, 0.0  ;;  %v1546_v29 = vsel %vm1443_vm2, %v1538_v35, 0.0  ;;  %v1555_v33 = vsel %vm1443_vm2, %v1541_v42, 0.0  ;;  %v1544_v26 = vmul.f32 %v1536_v50, %v1534_v0 }
 0x478   :  { %1553 = vadd.xlane.f32.xlu1 %v1552_v44  ;;  %1547 = vadd.xlane.f32.xlu0 %v1546_v29  ;;  %v1549_v14 = vsel %vm1443_vm2, %v1539_v63, 0.0  ;;  %v1561_v48 = vsel %vm1443_vm2, %v1543_v5, 0.0  ;;  %v1558_v24 = vsel %vm1443_vm2, %v1542_v21, 0.0  ;;  %v1545_v28 = vmul.f32 %v1536_v50, %v1535_v54 }
 0x479   :  { %v1564_v8 = vsel %vm1443_vm2, %v1544_v26, 0.0 }
 0x47a   :  { %v1567_v30 = vsel %vm1443_vm2, %v1545_v28, 0.0 }
 0x47c   :  { %1556 = vadd.xlane.f32.xlu1 %v1555_v33  ;;  %1550 = vadd.xlane.f32.xlu0 %v1549_v14 }
 0x480   :  { %1562 = vadd.xlane.f32.xlu1 %v1561_v48  ;;  %1559 = vadd.xlane.f32.xlu0 %v1558_v24 }
 0x484   :  { %1568 = vadd.xlane.f32.xlu1 %v1567_v30  ;;  %1565 = vadd.xlane.f32.xlu0 %v1564_v8 }
 0x501   :  { %v1554_v45 = vpop.xlane.xlu1 %1553  ;;  %v1548_v52 = vpop.xlane.xlu0 %1547 }
 0x502   :  { %v1572_v4 = vadd.f32 %v1554_v45, %v1537_v51  ;;  %v1570_v49 = vadd.f32 %v1548_v52, %v1537_v51 }
 0x504   :  { %v1580_v53 = vsub.f32 0.0, %v1572_v4  ;;  %v1578_v17 = vsub.f32 0.0, %v1570_v49 }
 0x505   :  { %v1557_v2 = vpop.xlane.xlu1 %1556  ;;  %v1551_v18 = vpop.xlane.xlu0 %1550 }
 0x506   :  { %v1590_v3 = vmul.f32 1.442695, %v1580_v53  ;;  %v1586_v55 = vmul.f32 1.442695, %v1578_v17  ;;  %v1573_v37 = vadd.f32 %v1557_v2, %v1537_v51  ;;  %v1571_v6 = vadd.f32 %v1551_v18, %v1537_v51 }
 0x508   :  { %1892 = vpow2.f32 %v1590_v3  ;;  %v1581_v34 = vsub.f32 0.0, %v1573_v37  ;;  %v1579_v38 = vsub.f32 0.0, %v1571_v6 }
 0x509   :  { %1894 = vpow2.f32 %v1586_v55  ;;  %v1563_v41 = vpop.xlane.xlu1 %1562  ;;  %v1560_v11 = vpop.xlane.xlu0 %1559 }
 0x50a   :  { %v1592_v7 = vmul.f32 1.442695, %v1581_v34  ;;  %v1588_v27 = vmul.f32 1.442695, %v1579_v38  ;;  %v1575_v62 = vadd.f32 %v1563_v41, %v1537_v51  ;;  %v1574_v1 = vadd.f32 %v1560_v11, %v1537_v51 }
 0x50c   :  { %1896 = vpow2.f32 %v1592_v7  ;;  %v1583_v25 = vsub.f32 0.0, %v1575_v62  ;;  %v1582_v46 = vsub.f32 0.0, %v1574_v1 }
 0x50d   :  { %1898 = vpow2.f32 %v1588_v27  ;;  %v1569_v19 = vpop.xlane.xlu1 %1568  ;;  %v1566_v61 = vpop.xlane.xlu0 %1565 }
 0x50e   :  { %v1596_v23 = vmul.f32 1.442695, %v1583_v25  ;;  %v1594_v58 = vmul.f32 1.442695, %v1582_v46  ;;  %v1577_v20 = vadd.f32 %v1569_v19, %v1537_v51  ;;  %v1576_v32 = vadd.f32 %v1566_v61, %v1537_v51 }
 0x510   :  { %1900 = vpow2.f32 %v1596_v23  ;;  %v1585_v22 = vsub.f32 0.0, %v1577_v20  ;;  %v1584_v15 = vsub.f32 0.0, %v1576_v32 }
 0x511   :  { %1902 = vpow2.f32 %v1594_v58 }
 0x512   :  { %v1600_v50 = vmul.f32 1.442695, %v1585_v22  ;;  %v1598_v12 = vmul.f32 1.442695, %v1584_v15 }
 0x514   :  { %1904 = vpow2.f32 %v1600_v50 }
 0x515   :  { %v1893_v57 = vpop.eup %1892  ;;  %1906 = vpow2.f32 %v1598_v12 }
 0x516   :  { %v1895_v56 = vpop.eup %1894  ;;  %v1604_v47 = vadd.f32 1.0, %v1893_v57 }
 0x517   :  { %v1602_v13 = vadd.f32 1.0, %v1895_v56 }
 0x518   :  { %1908 = vrcp.f32 %v1604_v47 }
 0x519   :  { %v1897_v59 = vpop.eup %1896  ;;  %1910 = vrcp.f32 %v1602_v13 }
 0x51a   :  { %v1899_v16 = vpop.eup %1898  ;;  %v1605_v36 = vadd.f32 1.0, %v1897_v59 }
 0x51b   :  { %v1603_v40 = vadd.f32 1.0, %v1899_v16 }
 0x51c   :  { %1912 = vrcp.f32 %v1605_v36 }
 0x51d   :  { %v1901_v31 = vpop.eup %1900  ;;  %1914 = vrcp.f32 %v1603_v40 }
 0x51e   :  { %v1903_v9 = vpop.eup %1902  ;;  %v1607_v35 = vadd.f32 1.0, %v1901_v31 }
 0x51f   :  { %v1606_v43 = vadd.f32 1.0, %v1903_v9 }
 0x520   :  { %1916 = vrcp.f32 %v1607_v35 }
 0x521   :  { %v1905_v39 = vpop.eup %1904  ;;  %1918 = vrcp.f32 %v1606_v43 }
 0x522   :  { %v1907_v10 = vpop.eup %1906  ;;  %v1609_v60 = vadd.f32 1.0, %v1905_v39 }
 0x523   :  { %v1608_v44 = vadd.f32 1.0, %v1907_v10 }
 0x524   :  { %1920 = vrcp.f32 %v1609_v60 }
 0x525   :  { %v1909_v29 = vpop.eup %1908  ;;  %1922 = vrcp.f32 %v1608_v44 }
 0x526   :  { %v1911_v42 = vpop.eup %1910  ;;  %1621 = vst.msk [vmem:[%s2612_s5 + $0x10] sm:$0xff] %vm1618_vm3, %v1909_v29 }
 0x527   :  { %1619 = vst.msk [vmem:[%s2612_s5] sm:$0xff] %vm1618_vm3, %v1911_v42 }
 0x529   :  { %v1913_v63 = vpop.eup %1912 }
 0x52a   :  { %v1915_v54 = vpop.eup %1914  ;;  %1622 = vst.msk [vmem:[%s2612_s5 + $0x18] sm:$0xff] %vm1618_vm3, %v1913_v63 }
 0x52b   :  { %1620 = vst.msk [vmem:[%s2612_s5 + $0x8] sm:$0xff] %vm1618_vm3, %v1915_v54 }
 0x52d   :  { %v1917_v0 = vpop.eup %1916 }
 0x52e   :  { %v1919_v33 = vpop.eup %1918  ;;  %1624 = vst.msk [vmem:[%s2612_s5 + $0x28] sm:$0xff] %vm1618_vm3, %v1917_v0 }
 0x52f   :  { %1623 = vst.msk [vmem:[%s2612_s5 + $0x20] sm:$0xff] %vm1618_vm3, %v1919_v33 }
 0x531   :  { %v1921_v14 = vpop.eup %1920 }
 0x532   :  { %v1923_v5 = vpop.eup %1922  ;;  %1626 = vst.msk [vmem:[%s2612_s5 + $0x38] sm:$0xff] %vm1618_vm3, %v1921_v14 }
 0x533   :  { %1625 = vst.msk [vmem:[%s2612_s5 + $0x30] sm:$0xff] %vm1618_vm3, %v1923_v5 }
 0x534   :  { %1631 = vsyncpa [#allocation3], 1 }
 0x535   :  { %1632 = vsyncpa [#allocation5], 1 }

</bundles_post_ra>
